<compile_context>
chip_gen: v5e
topology: v5e:2x2
jax: 0.10.0
libtpu: 0.0.40
codegen_flags: <defaults>
</compile_context>

<pallas_src>
import math
from functools import partial

import jax
import jax.numpy as jnp
from jax.experimental import pallas as pl
from jax.experimental.pallas import tpu as pltpu

LANE = 128  # lane width; all per-head feature blocks are padded to this


def _unimp_fused_kernel(x_ref, adj_ref, w1_ref, b1_ref, w2_ref, b2_ref,
                        o_ref, h1_ref, *, heads1, out_ch, c_pad):
    """Fused UniMP forward: conv1 -> ReLU -> (dropout=id) -> conv2 -> log_softmax."""
    neg_big = jnp.float32(-1e30)

    # int8 adjacency -> f32 0/1 multiplicative mask (single conversion per call)
    adjf = adj_ref[...].astype(jnp.float32)           # [N, N] (dst, src)
    mask = adjf > 0.0

    # contract the LAST dim of both operands: "NT" matmul, no explicit transpose
    dn = (((1,), (1,)), ((), ()))
    scale = jnp.float32(1.0 / math.sqrt(out_ch))

    def attention_heads(x, w, b, heads):
        # x / w are bf16 MXU operands; accumulation & softmax math in f32.
        proj = jnp.dot(x, w, preferred_element_type=jnp.float32) + b
        d = heads * c_pad
        q = proj[:, 0 * d:1 * d]
        k = proj[:, 1 * d:2 * d]
        v = proj[:, 2 * d:3 * d]
        skip = proj[:, 3 * d:4 * d]
        outs = []
        for h in range(heads):                        # static loop; 128-aligned slices
            lo = h * c_pad
            qh = q[:, lo:lo + c_pad].astype(jnp.bfloat16)
            kh = k[:, lo:lo + c_pad].astype(jnp.bfloat16)
            vh = v[:, lo:lo + c_pad].astype(jnp.bfloat16)
            s = jax.lax.dot_general(qh, kh, dn,
                                    preferred_element_type=jnp.float32) * scale
            s = jnp.where(mask, s, neg_big)           # masked scores (for the max)
            m = jnp.max(s, axis=-1, keepdims=True)
            e = jnp.exp(s - m) * adjf                 # single multiplicative mask
            denom = jnp.sum(e, axis=-1, keepdims=True)
            agg = jnp.dot(e.astype(jnp.bfloat16), vh,
                          preferred_element_type=jnp.float32)
            # normalize the [N,C] aggregate (not the [N,N] alpha); EUP approx recip.
            inv = pl.reciprocal(jnp.maximum(denom, jnp.float32(1e-30)), approx=True)
            outs.append(agg * inv + skip[:, lo:lo + c_pad])
        return outs

    # ---- layer 1: TransformerConv(F_in -> hid, heads) + fused ReLU ---------------
    x = x_ref[...]                                    # bf16 [N, 128]
    h1_heads = attention_heads(x, w1_ref[...], b1_ref[...], heads1)
    for h in range(heads1):                           # aligned 128-lane block stores
        h1_ref[:, h * c_pad:(h + 1) * c_pad] = (
            jnp.maximum(h1_heads[h], 0.0).astype(h1_ref.dtype))
    # TODO(synk): F.dropout(p=0.5) is identity at inference (eval mode).

    # ---- layer 2: TransformerConv(hid*heads -> hid, heads=1) + log_softmax -------
    x2 = h1_ref[...]                                  # bf16 [N, heads1*128]
    (out,) = attention_heads(x2, w2_ref[...], b2_ref[...], 1)

    # log_softmax over the VALID lanes only (padded lanes are exact zeros).
    col = jax.lax.broadcasted_iota(jnp.int32, out.shape, 1)
    om = jnp.where(col < out_ch, out, neg_big)
    m = jnp.max(om, axis=-1, keepdims=True)
    lse = jnp.log(jnp.sum(jnp.exp(om - m), axis=-1, keepdims=True)) + m
    o_ref[...] = (out - lse).astype(o_ref.dtype)      # lane-dense [N, 128] store


def _pad_blocks(a, axis, n_blocks, block, block_pad):
    """Zero-pad each `block`-sized chunk along `axis` to `block_pad`."""
    shp = a.shape
    a = a.reshape(shp[:axis] + (n_blocks, block) + shp[axis + 1:])
    pad = [(0, 0)] * a.ndim
    pad[axis + 1] = (0, block_pad - block)
    a = jnp.pad(a, pad)
    return a.reshape(shp[:axis] + (n_blocks * block_pad,) + shp[axis + 1:])


def pad_conv_params(p, *, in_blocks, in_block, heads, out_ch, c_pad):
    """Fuse Q|K|V|skip weights/biases into ONE lane-dense (per-head 128-lane block)
    matrix. Weights go to bf16 (MXU operands + halved DMA); biases stay f32."""
    def pw(w):
        w = _pad_blocks(w, 0, in_blocks, in_block, c_pad)
        w = _pad_blocks(w, 1, heads, out_ch, c_pad)
        return w

    def pb(b):
        return _pad_blocks(b, 1, heads, out_ch, c_pad)

    w_all = jnp.concatenate(
        [pw(p["wq"]), pw(p["wk"]), pw(p["wv"]), pw(p["ws"])], axis=1
    ).astype(jnp.bfloat16)
    b_all = jnp.concatenate(
        [pb(p["bq"]), pb(p["bk"]), pb(p["bv"]), pb(p["bs"])], axis=1
    ).astype(jnp.float32)
    return w_all, b_all


def init_conv_params(key, in_ch, out_ch, heads):
    """Deterministic synthetic parameters (Linear stored as [in, out] + bias [1, out])."""
    ks = jax.random.split(key, 8)
    d = heads * out_ch
    scale = 1.0 / math.sqrt(in_ch)
    mk = lambda k: (jax.random.normal(k, (in_ch, d), jnp.float32) * scale)
    bk = lambda k: (jax.random.normal(k, (1, d), jnp.float32) * 0.01)
    return {
        "wq": mk(ks[0]), "bq": bk(ks[1]),
        "wk": mk(ks[2]), "bk": bk(ks[3]),
        "wv": mk(ks[4]), "bv": bk(ks[5]),
        "ws": mk(ks[6]), "bs": bk(ks[7]),
    }


def unimp_forward(x, edge_index, params1, params2, *, hid, heads):
    n, f_in = x.shape
    c_pad = LANE
    n_pad = ((n + 7) // 8) * 8

    src = edge_index[0].astype(jnp.int32)
    dst = edge_index[1].astype(jnp.int32)
    # dense adjacency: adj[i, j] = 1 iff edge j -> i, stored as int8 (4x smaller DMA)
    adj = jnp.zeros((n_pad, n_pad), jnp.int8).at[dst, src].set(1)

    # lane-dense, bf16 node features (zero-padded feature columns / node rows)
    x_pad = jnp.zeros((n_pad, c_pad), jnp.float32).at[:n, :f_in].set(x)
    x_pad = x_pad.astype(jnp.bfloat16)

    w1, b1 = pad_conv_params(params1, in_blocks=1, in_block=f_in,
                             heads=heads, out_ch=hid, c_pad=c_pad)
    w2, b2 = pad_conv_params(params2, in_blocks=heads, in_block=hid,
                             heads=1, out_ch=hid, c_pad=c_pad)

    kernel = partial(_unimp_fused_kernel, heads1=heads, out_ch=hid, c_pad=c_pad)

    d1 = heads * c_pad
    flops = (2 * n_pad * c_pad * (4 * d1)          # layer-1 fused projection matmul
             + heads * 4 * n_pad * n_pad * c_pad   # layer-1 scores + aggregation
             + 2 * n_pad * d1 * (4 * c_pad)        # layer-2 fused projection matmul
             + 4 * n_pad * n_pad * c_pad)          # layer-2 scores + aggregation
    transcendentals = (heads + 1) * n_pad * (n_pad + 1) + n_pad * (c_pad + 1)
    inputs = (x_pad, adj, w1, b1, w2, b2)
    bytes_accessed = int(sum(int(a.size) * a.dtype.itemsize for a in inputs)
                         + n_pad * c_pad * 4)

    vmem = pl.BlockSpec(memory_space=pltpu.MemorySpace.VMEM)
    out_pad = pl.pallas_call(
        kernel,
        out_shape=jax.ShapeDtypeStruct((n_pad, c_pad), jnp.float32),
        in_specs=[vmem] * len(inputs),
        out_specs=vmem,
        scratch_shapes=[pltpu.VMEM((n_pad, heads * c_pad), jnp.bfloat16)],
        compiler_params=pltpu.CompilerParams(vmem_limit_bytes=32 * 1024 * 1024),
        cost_estimate=pl.CostEstimate(flops=flops,
                                      transcendentals=transcendentals,
                                      bytes_accessed=bytes_accessed),
    )(*inputs)

    return out_pad[:n, :hid]


if __name__ == "__main__":
    # Small, deterministic problem: 16 nodes, 8 input features, hid_size=8, 2 heads.
    N, F_IN, HID, HEADS = 16, 8, 8, 2

    key = jax.random.PRNGKey(0)
    kx, k1, k2 = jax.random.split(key, 3)

    x = jax.random.normal(kx, (N, F_IN), jnp.float32)

    # deterministic edge list: self loops + ring(+1) + ring(+3)  -> edge_index [2, 48]
    idx = jnp.arange(N, dtype=jnp.int32)
    src = jnp.concatenate([idx, idx, idx])
    dst = jnp.concatenate([idx, (idx + 1) % N, (idx + 3) % N])
    edge_index = jnp.stack([src, dst], axis=0)

    params1 = init_conv_params(k1, F_IN, HID, HEADS)      # conv1: F_IN -> HID*HEADS
    params2 = init_conv_params(k2, HID * HEADS, HID, 1)   # conv2: HID*HEADS -> HID

    out = unimp_forward(x, edge_index, params1, params2, hid=HID, heads=HEADS)
    out = jax.block_until_ready(out)

    assert out.shape == (N, HID)
    assert bool(jnp.all(jnp.isfinite(out)))
    # rows of log_softmax must sum (in prob space) to ~1
    assert bool(jnp.allclose(jnp.sum(jnp.exp(out), axis=-1), 1.0, atol=1e-4))
    print("KERNEL_OK")
</pallas_src>

<mosaic_0001>
module attributes {stable_mosaic.version = 11 : i64} {
  func.func @_unimp_fused_kernel(%arg0: memref<16x128xbf16, #tpu.memory_space<vmem>>, %arg1: memref<16x16xi8, #tpu.memory_space<vmem>>, %arg2: memref<128x1024xbf16, #tpu.memory_space<vmem>>, %arg3: memref<1x1024xf32, #tpu.memory_space<vmem>>, %arg4: memref<256x512xbf16, #tpu.memory_space<vmem>>, %arg5: memref<1x512xf32, #tpu.memory_space<vmem>>, %arg6: memref<16x128xf32, #tpu.memory_space<vmem>>, %arg7: memref<16x256xbf16, #tpu.memory_space<vmem>>) attributes {dimension_semantics = [], scalar_prefetch = 0 : i64, scratch_operands = 1 : i64, tpu.core_type = #tpu.core_type<tc>} {
    %c0 = arith.constant 0 : index
    %c0_0 = arith.constant 0 : index
    %0 = vector.load %arg1[%c0, %c0_0] : memref<16x16xi8, #tpu.memory_space<vmem>>, vector<16x16xi8>
    %1 = arith.sitofp %0 : vector<16x16xi8> to vector<16x16xf32>
    %cst = arith.constant 0.000000e+00 : f32
    %2 = vector.broadcast %cst : f32 to vector<16x16xf32>
    %3 = arith.cmpf ogt, %1, %2 : vector<16x16xf32>
    %c0_1 = arith.constant 0 : index
    %c0_2 = arith.constant 0 : index
    %4 = vector.load %arg0[%c0_1, %c0_2] : memref<16x128xbf16, #tpu.memory_space<vmem>>, vector<16x128xbf16>
    %c0_3 = arith.constant 0 : index
    %c0_4 = arith.constant 0 : index
    %5 = vector.load %arg2[%c0_3, %c0_4] : memref<128x1024xbf16, #tpu.memory_space<vmem>>, vector<128x1024xbf16>
    %c0_5 = arith.constant 0 : index
    %c0_6 = arith.constant 0 : index
    %6 = vector.load %arg3[%c0_5, %c0_6] : memref<1x1024xf32, #tpu.memory_space<vmem>>, vector<1x1024xf32>
    %cst_7 = arith.constant dense<0.000000e+00> : vector<16x1024xf32>
    %7 = tpu.matmul %4, %5, %cst_7 {dimension_numbers = #tpu.dot_dimension_numbers<[1], [0], [0], [1], [0, 0, 1, 1], [], []>} : vector<16x128xbf16>, vector<128x1024xbf16>, vector<16x1024xf32> -> vector<16x1024xf32>
    %8 = vector.broadcast %6 : vector<1x1024xf32> to vector<16x1024xf32>
    %9 = arith.addf %7, %8 : vector<16x1024xf32>
    %10 = vector.extract_strided_slice %9 {offsets = [0, 0], sizes = [16, 256], strides = [1, 1]} : vector<16x1024xf32> to vector<16x256xf32>
    %11 = vector.extract_strided_slice %9 {offsets = [0, 256], sizes = [16, 256], strides = [1, 1]} : vector<16x1024xf32> to vector<16x256xf32>
    %12 = vector.extract_strided_slice %9 {offsets = [0, 512], sizes = [16, 256], strides = [1, 1]} : vector<16x1024xf32> to vector<16x256xf32>
    %13 = vector.extract_strided_slice %9 {offsets = [0, 768], sizes = [16, 256], strides = [1, 1]} : vector<16x1024xf32> to vector<16x256xf32>
    %14 = vector.extract_strided_slice %10 {offsets = [0, 0], sizes = [16, 128], strides = [1, 1]} : vector<16x256xf32> to vector<16x128xf32>
    %15 = arith.truncf %14 : vector<16x128xf32> to vector<16x128xbf16>
    %16 = vector.extract_strided_slice %11 {offsets = [0, 0], sizes = [16, 128], strides = [1, 1]} : vector<16x256xf32> to vector<16x128xf32>
    %17 = arith.truncf %16 : vector<16x128xf32> to vector<16x128xbf16>
    %18 = vector.extract_strided_slice %12 {offsets = [0, 0], sizes = [16, 128], strides = [1, 1]} : vector<16x256xf32> to vector<16x128xf32>
    %19 = arith.truncf %18 : vector<16x128xf32> to vector<16x128xbf16>
    %cst_8 = arith.constant dense<0.000000e+00> : vector<16x16xf32>
    %20 = tpu.matmul %15, %17, %cst_8 {dimension_numbers = #tpu.dot_dimension_numbers<[1], [1], [0], [0], [0, 0, 1, 0], [], []>} : vector<16x128xbf16>, vector<16x128xbf16>, vector<16x16xf32> -> vector<16x16xf32>
    %cst_9 = arith.constant 0.353553385 : f32
    %21 = vector.broadcast %cst_9 : f32 to vector<16x16xf32>
    %22 = arith.mulf %20, %21 : vector<16x16xf32>
    %cst_10 = arith.constant -1.000000e+30 : f32
    %23 = vector.broadcast %cst_10 : f32 to vector<16x16xf32>
    %24 = arith.select %3, %22, %23 : vector<16x16xi1>, vector<16x16xf32>
    %cst_11 = arith.constant dense<0xFF800000> : vector<16xf32>
    %25 = vector.multi_reduction <maximumf>, %24, %cst_11 [1] : vector<16x16xf32> to vector<16xf32>
    %26 = vector.shape_cast %25 : vector<16xf32> to vector<16x1xf32>
    %27 = vector.broadcast %26 : vector<16x1xf32> to vector<16x16xf32>
    %28 = arith.subf %24, %27 : vector<16x16xf32>
    %29 = math.exp %28 : vector<16x16xf32>
    %30 = arith.mulf %29, %1 : vector<16x16xf32>
    %cst_12 = arith.constant dense<0.000000e+00> : vector<16xf32>
    %31 = vector.multi_reduction <add>, %30, %cst_12 [1] : vector<16x16xf32> to vector<16xf32>
    %32 = vector.shape_cast %31 : vector<16xf32> to vector<16x1xf32>
    %33 = arith.truncf %30 : vector<16x16xf32> to vector<16x16xbf16>
    %cst_13 = arith.constant dense<0.000000e+00> : vector<16x128xf32>
    %34 = tpu.matmul %33, %19, %cst_13 {dimension_numbers = #tpu.dot_dimension_numbers<[1], [0], [0], [1], [0, 0, 1, 1], [], []>} : vector<16x16xbf16>, vector<16x128xbf16>, vector<16x128xf32> -> vector<16x128xf32>
    %cst_14 = arith.constant 1.000000e-30 : f32
    %35 = vector.broadcast %cst_14 : f32 to vector<16x1xf32>
    %36 = arith.maximumf %32, %35 : vector<16x1xf32>
    %37 = tpu.reciprocal %36 {approx = true} : vector<16x1xf32> -> vector<16x1xf32>
    %38 = vector.broadcast %37 : vector<16x1xf32> to vector<16x128xf32>
    %39 = arith.mulf %34, %38 : vector<16x128xf32>
    %40 = vector.extract_strided_slice %13 {offsets = [0, 0], sizes = [16, 128], strides = [1, 1]} : vector<16x256xf32> to vector<16x128xf32>
    %41 = arith.addf %39, %40 : vector<16x128xf32>
    %42 = vector.extract_strided_slice %10 {offsets = [0, 128], sizes = [16, 128], strides = [1, 1]} : vector<16x256xf32> to vector<16x128xf32>
    %43 = arith.truncf %42 : vector<16x128xf32> to vector<16x128xbf16>
    %44 = vector.extract_strided_slice %11 {offsets = [0, 128], sizes = [16, 128], strides = [1, 1]} : vector<16x256xf32> to vector<16x128xf32>
    %45 = arith.truncf %44 : vector<16x128xf32> to vector<16x128xbf16>
    %46 = vector.extract_strided_slice %12 {offsets = [0, 128], sizes = [16, 128], strides = [1, 1]} : vector<16x256xf32> to vector<16x128xf32>
    %47 = arith.truncf %46 : vector<16x128xf32> to vector<16x128xbf16>
    %cst_15 = arith.constant dense<0.000000e+00> : vector<16x16xf32>
    %48 = tpu.matmul %43, %45, %cst_15 {dimension_numbers = #tpu.dot_dimension_numbers<[1], [1], [0], [0], [0, 0, 1, 0], [], []>} : vector<16x128xbf16>, vector<16x128xbf16>, vector<16x16xf32> -> vector<16x16xf32>
    %cst_16 = arith.constant 0.353553385 : f32
    %49 = vector.broadcast %cst_16 : f32 to vector<16x16xf32>
    %50 = arith.mulf %48, %49 : vector<16x16xf32>
    %cst_17 = arith.constant -1.000000e+30 : f32
    %51 = vector.broadcast %cst_17 : f32 to vector<16x16xf32>
    %52 = arith.select %3, %50, %51 : vector<16x16xi1>, vector<16x16xf32>
    %cst_18 = arith.constant dense<0xFF800000> : vector<16xf32>
    %53 = vector.multi_reduction <maximumf>, %52, %cst_18 [1] : vector<16x16xf32> to vector<16xf32>
    %54 = vector.shape_cast %53 : vector<16xf32> to vector<16x1xf32>
    %55 = vector.broadcast %54 : vector<16x1xf32> to vector<16x16xf32>
    %56 = arith.subf %52, %55 : vector<16x16xf32>
    %57 = math.exp %56 : vector<16x16xf32>
    %58 = arith.mulf %57, %1 : vector<16x16xf32>
    %cst_19 = arith.constant dense<0.000000e+00> : vector<16xf32>
    %59 = vector.multi_reduction <add>, %58, %cst_19 [1] : vector<16x16xf32> to vector<16xf32>
    %60 = vector.shape_cast %59 : vector<16xf32> to vector<16x1xf32>
    %61 = arith.truncf %58 : vector<16x16xf32> to vector<16x16xbf16>
    %cst_20 = arith.constant dense<0.000000e+00> : vector<16x128xf32>
    %62 = tpu.matmul %61, %47, %cst_20 {dimension_numbers = #tpu.dot_dimension_numbers<[1], [0], [0], [1], [0, 0, 1, 1], [], []>} : vector<16x16xbf16>, vector<16x128xbf16>, vector<16x128xf32> -> vector<16x128xf32>
    %cst_21 = arith.constant 1.000000e-30 : f32
    %63 = vector.broadcast %cst_21 : f32 to vector<16x1xf32>
    %64 = arith.maximumf %60, %63 : vector<16x1xf32>
    %65 = tpu.reciprocal %64 {approx = true} : vector<16x1xf32> -> vector<16x1xf32>
    %66 = vector.broadcast %65 : vector<16x1xf32> to vector<16x128xf32>
    %67 = arith.mulf %62, %66 : vector<16x128xf32>
    %68 = vector.extract_strided_slice %13 {offsets = [0, 128], sizes = [16, 128], strides = [1, 1]} : vector<16x256xf32> to vector<16x128xf32>
    %69 = arith.addf %67, %68 : vector<16x128xf32>
    %cst_22 = arith.constant 0.000000e+00 : f32
    %70 = vector.broadcast %cst_22 : f32 to vector<16x128xf32>
    %71 = arith.maximumf %41, %70 : vector<16x128xf32>
    %72 = arith.truncf %71 : vector<16x128xf32> to vector<16x128xbf16>
    %c0_23 = arith.constant 0 : index
    %c0_24 = arith.constant 0 : index
    %73 = vector.load %arg7[%c0_23, %c0_24] : memref<16x256xbf16, #tpu.memory_space<vmem>>, vector<16x128xbf16>
    tpu.vector_store %arg7[%c0_23, %c0_24], %72 {strides = array<i32>} : memref<16x256xbf16, #tpu.memory_space<vmem>>, vector<16x128xbf16>,
    %cst_25 = arith.constant 0.000000e+00 : f32
    %74 = vector.broadcast %cst_25 : f32 to vector<16x128xf32>
    %75 = arith.maximumf %69, %74 : vector<16x128xf32>
    %76 = arith.truncf %75 : vector<16x128xf32> to vector<16x128xbf16>
    %c0_26 = arith.constant 0 : index
    %c128 = arith.constant 128 : index
    %77 = vector.load %arg7[%c0_26, %c128] : memref<16x256xbf16, #tpu.memory_space<vmem>>, vector<16x128xbf16>
    tpu.vector_store %arg7[%c0_26, %c128], %76 {strides = array<i32>} : memref<16x256xbf16, #tpu.memory_space<vmem>>, vector<16x128xbf16>,
    %c0_27 = arith.constant 0 : index
    %c0_28 = arith.constant 0 : index
    %78 = vector.load %arg7[%c0_27, %c0_28] : memref<16x256xbf16, #tpu.memory_space<vmem>>, vector<16x256xbf16>
    %c0_29 = arith.constant 0 : index
    %c0_30 = arith.constant 0 : index
    %79 = vector.load %arg4[%c0_29, %c0_30] : memref<256x512xbf16, #tpu.memory_space<vmem>>, vector<256x512xbf16>
    %c0_31 = arith.constant 0 : index
    %c0_32 = arith.constant 0 : index
    %80 = vector.load %arg5[%c0_31, %c0_32] : memref<1x512xf32, #tpu.memory_space<vmem>>, vector<1x512xf32>
    %cst_33 = arith.constant dense<0.000000e+00> : vector<16x512xf32>
    %81 = tpu.matmul %78, %79, %cst_33 {dimension_numbers = #tpu.dot_dimension_numbers<[1], [0], [0], [1], [0, 0, 1, 1], [], []>} : vector<16x256xbf16>, vector<256x512xbf16>, vector<16x512xf32> -> vector<16x512xf32>
    %82 = vector.broadcast %80 : vector<1x512xf32> to vector<16x512xf32>
    %83 = arith.addf %81, %82 : vector<16x512xf32>
    %84 = vector.extract_strided_slice %83 {offsets = [0, 0], sizes = [16, 128], strides = [1, 1]} : vector<16x512xf32> to vector<16x128xf32>
    %85 = vector.extract_strided_slice %83 {offsets = [0, 128], sizes = [16, 128], strides = [1, 1]} : vector<16x512xf32> to vector<16x128xf32>
    %86 = vector.extract_strided_slice %83 {offsets = [0, 256], sizes = [16, 128], strides = [1, 1]} : vector<16x512xf32> to vector<16x128xf32>
    %87 = vector.extract_strided_slice %83 {offsets = [0, 384], sizes = [16, 128], strides = [1, 1]} : vector<16x512xf32> to vector<16x128xf32>
    %88 = arith.truncf %84 : vector<16x128xf32> to vector<16x128xbf16>
    %89 = arith.truncf %85 : vector<16x128xf32> to vector<16x128xbf16>
    %90 = arith.truncf %86 : vector<16x128xf32> to vector<16x128xbf16>
    %cst_34 = arith.constant dense<0.000000e+00> : vector<16x16xf32>
    %91 = tpu.matmul %88, %89, %cst_34 {dimension_numbers = #tpu.dot_dimension_numbers<[1], [1], [0], [0], [0, 0, 1, 0], [], []>} : vector<16x128xbf16>, vector<16x128xbf16>, vector<16x16xf32> -> vector<16x16xf32>
    %cst_35 = arith.constant 0.353553385 : f32
    %92 = vector.broadcast %cst_35 : f32 to vector<16x16xf32>
    %93 = arith.mulf %91, %92 : vector<16x16xf32>
    %cst_36 = arith.constant -1.000000e+30 : f32
    %94 = vector.broadcast %cst_36 : f32 to vector<16x16xf32>
    %95 = arith.select %3, %93, %94 : vector<16x16xi1>, vector<16x16xf32>
    %cst_37 = arith.constant dense<0xFF800000> : vector<16xf32>
    %96 = vector.multi_reduction <maximumf>, %95, %cst_37 [1] : vector<16x16xf32> to vector<16xf32>
    %97 = vector.shape_cast %96 : vector<16xf32> to vector<16x1xf32>
    %98 = vector.broadcast %97 : vector<16x1xf32> to vector<16x16xf32>
    %99 = arith.subf %95, %98 : vector<16x16xf32>
    %100 = math.exp %99 : vector<16x16xf32>
    %101 = arith.mulf %100, %1 : vector<16x16xf32>
    %cst_38 = arith.constant dense<0.000000e+00> : vector<16xf32>
    %102 = vector.multi_reduction <add>, %101, %cst_38 [1] : vector<16x16xf32> to vector<16xf32>
    %103 = vector.shape_cast %102 : vector<16xf32> to vector<16x1xf32>
    %104 = arith.truncf %101 : vector<16x16xf32> to vector<16x16xbf16>
    %cst_39 = arith.constant dense<0.000000e+00> : vector<16x128xf32>
    %105 = tpu.matmul %104, %90, %cst_39 {dimension_numbers = #tpu.dot_dimension_numbers<[1], [0], [0], [1], [0, 0, 1, 1], [], []>} : vector<16x16xbf16>, vector<16x128xbf16>, vector<16x128xf32> -> vector<16x128xf32>
    %cst_40 = arith.constant 1.000000e-30 : f32
    %106 = vector.broadcast %cst_40 : f32 to vector<16x1xf32>
    %107 = arith.maximumf %103, %106 : vector<16x1xf32>
    %108 = tpu.reciprocal %107 {approx = true} : vector<16x1xf32> -> vector<16x1xf32>
    %109 = vector.broadcast %108 : vector<16x1xf32> to vector<16x128xf32>
    %110 = arith.mulf %105, %109 : vector<16x128xf32>
    %111 = arith.addf %110, %87 : vector<16x128xf32>
    %112 = tpu.iota {dimensions = array<i32: 1>} : vector<16x128xi32>
    %c8_i32 = arith.constant 8 : i32
    %113 = vector.broadcast %c8_i32 : i32 to vector<16x128xi32>
    %114 = arith.cmpi slt, %112, %113 : vector<16x128xi32>
    %cst_41 = arith.constant -1.000000e+30 : f32
    %115 = vector.broadcast %cst_41 : f32 to vector<16x128xf32>
    %116 = arith.select %114, %111, %115 : vector<16x128xi1>, vector<16x128xf32>
    %cst_42 = arith.constant dense<0xFF800000> : vector<16xf32>
    %117 = vector.multi_reduction <maximumf>, %116, %cst_42 [1] : vector<16x128xf32> to vector<16xf32>
    %118 = vector.shape_cast %117 : vector<16xf32> to vector<16x1xf32>
    %119 = vector.broadcast %118 : vector<16x1xf32> to vector<16x128xf32>
    %120 = arith.subf %116, %119 : vector<16x128xf32>
    %121 = math.exp %120 : vector<16x128xf32>
    %cst_43 = arith.constant dense<0.000000e+00> : vector<16xf32>
    %122 = vector.multi_reduction <add>, %121, %cst_43 [1] : vector<16x128xf32> to vector<16xf32>
    %123 = vector.shape_cast %122 : vector<16xf32> to vector<16x1xf32>
    %124 = math.log %123 : vector<16x1xf32>
    %125 = arith.addf %124, %118 : vector<16x1xf32>
    %126 = vector.broadcast %125 : vector<16x1xf32> to vector<16x128xf32>
    %127 = arith.subf %111, %126 : vector<16x128xf32>
    %c0_44 = arith.constant 0 : index
    %c0_45 = arith.constant 0 : index
    %128 = vector.load %arg6[%c0_44, %c0_45] : memref<16x128xf32, #tpu.memory_space<vmem>>, vector<16x128xf32>
    tpu.vector_store %arg6[%c0_44, %c0_45], %127 {strides = array<i32>} : memref<16x128xf32, #tpu.memory_space<vmem>>, vector<16x128xf32>,
    return
  }
}

</mosaic_0001>

<bundles_post_ra>
// kernel: tpu_custom_call.1
= control target key start
LH: loop header
LB: loop body
LE: loop exit
PB: predicated region body
PF: predicated region fallthrough
CT: control target
= control target key end

     0   :  { %11 = vsyncpa [#allocation4], 0  ;;  %s2426_s0 = inlined_call_operand.hbm [shape: bf16[16,128], index: 0, kind: input, shape index: {}]   ;;  %s2427_s1 = inlined_call_operand.hbm [shape: s8[16,16], index: 1, kind: input, shape index: {}]   ;;  %s2428_s2 = inlined_call_operand.hbm [shape: bf16[128,1024], index: 2, kind: input, shape index: {}]   ;;  %s2429_s3 = inlined_call_operand.hbm [shape: f32[1,1024], index: 3, kind: input, shape index: {}]   ;;  %s2430_s4 = inlined_call_operand.hbm [shape: bf16[256,512], index: 4, kind: input, shape index: {}]   ;;  %s2431_s5 = inlined_call_operand.vmem [shape: f32[1,512], index: 5, kind: input, shape index: {}]   ;;  %s2432_s6 = inlined_call_operand.hbm [shape: f32[16,128], index: 6, kind: output, shape index: {}]  }
   0x1   :  { %12 = vsyncpa [#allocation7], 0 }
   0x2   :  { %13 = vsyncpa [#allocation10], 0  ;;  %s32_s23 = sshll.u32 %s2427_s1, 4  ;;  %s33_s23 = int_to_ptr.hbm [resolvable:$true] %s32_s23 }
   0x3   :  { %14 = vsyncpa [#allocation5], 0  ;;  %s2274_s24 = smov [#allocation6]   ;;  %s59_s28 = sshll.u32 %s2429_s3, 4  ;;  %s60_s28 = int_to_ptr.hbm [resolvable:$true] %s59_s28 }
   0x4   :  { %s34_s25 = sshll.u32 %s2274_s24, 4  ;;  %s2275_s29 = smov 32   ;;  %s35_s25 = int_to_ptr.vmem [resolvable:$true] %s34_s25 }
   0x5   :  { %s2276_s30 = smov 2   ;;  %s2277_s7 = smov [#allocation9]  }
   0x6   :  { %40 = dma.hbm_to_vmem [thread:$0]  %s33_s23, 64, %s35_s25, [#allocation7], %s2275_s29, %s2275_s29, %s2276_s30  }
   0x7   :  { %s61_s8 = sshll.u32 %s2277_s7, 4  ;;  %s19_s11 = sshll.u32 %s2426_s0, 4  ;;  %s62_s8 = int_to_ptr.vmem [resolvable:$true] %s61_s8  ;;  %s20_s11 = int_to_ptr.hbm [resolvable:$true] %s19_s11 }
   0x8   :  { %64 = dma.hbm_to_vmem [thread:$0]  %s60_s28, 128, %s62_s8, [#allocation10]  }
   0x9   :  { %s2278_s1 = smov [#allocation3]   ;;  %s45_s3 = sshll.u32 %s2428_s2, 4  ;;  %s46_s3 = int_to_ptr.hbm [resolvable:$true] %s45_s3 }
   0xa   :  { %s21_s12 = sshll.u32 %s2278_s1, 4  ;;  %s2279_s15 = smov 64   ;;  %s22_s12 = int_to_ptr.vmem [resolvable:$true] %s21_s12 }
   0xb   :  { %s2280_s16 = smov 4   ;;  %s2281_s17 = smov [#allocation8]  }
   0xc   :  { %27 = dma.hbm_to_vmem [thread:$0]  %s20_s11, 128, %s22_s12, [#allocation4], %s2279_s15, %s2279_s15, %s2280_s16  }
   0xd   :  { %s47_s18 = sshll.u32 %s2281_s17, 4  ;;  %s69_s0 = sshll.u32 %s2430_s4, 4  ;;  %s48_s18 = int_to_ptr.vmem [resolvable:$true] %s47_s18  ;;  %s70_s0 = int_to_ptr.hbm [resolvable:$true] %s69_s0 }
   0xe   :  { %s2282_s21 = smov 512   ;;  %s2283_s22 = smov [#allocation11]  }
   0xf   :  { %53 = dma.hbm_to_vmem [thread:$0]  %s46_s3, 8192, %s48_s18, [#allocation7], %s2282_s21, %s2282_s21, %s2275_s29  }
  0x10   :  { %s71_s23 = sshll.u32 %s2283_s22, 4  ;;  %s2284_s24 = smov 256   ;;  %s72_s23 = int_to_ptr.vmem [resolvable:$true] %s71_s23 }
  0x11   :  { %s2285_s25 = smov 16  }
  0x12   :  { %77 = dma.hbm_to_vmem [thread:$0]  %s70_s0, 8192, %s72_s23, [#allocation10], %s2284_s24, %s2284_s24, %s2285_s25  }
  0x13   :  { %2266 = dma.done.wait [#allocation4], 128  }
  0x14   :  { %2267 = vsyncadd [#allocation4], 4294967168 }
  0x15   :  { %2268 = dma.done.wait [#allocation7], 8256  }
  0x16   :  { %2269 = vsyncadd [#allocation7], 4294959040 }
  0x17   :  { %2270 = dma.done.wait [#allocation10], 8320  }
  0x18   :  { %2271 = vsyncadd [#allocation10], 4294958976  ;;  %v1651_v0 = vld [vmem:[#allocation8 + $0x1c8] sm:$0xf]  ;;  %v1998_v2 = vld [vmem:[#allocation8 + $0x1cc] sm:$0xf] }
  0x19   :  { %v2002_v1 = vld [vmem:[#allocation8 + $0x1e4] sm:$0xf0]  ;;  %v1653_v4 = vld [vmem:[#allocation8 + $0x1e8] sm:$0xf0]  ;;  %v1997_v10 = vld [vmem:[#allocation8 + $0x1c4] sm:$0xf] }
  0x1a   :  { %v1652_v3 = vor.u32 %v2002_v1, %v1651_v0  ;;  %v1619_v5 = vld [vmem:[#allocation8 + $0x188] sm:$0xf]  ;;  %v1656_v7 = vor.u32 %v1998_v2, %v1653_v4  ;;  %v1990_v8 = vld [vmem:[#allocation8 + $0x18c] sm:$0xf]  ;;  %v1645_v12 = vld [vmem:[#allocation8 + $0x1e0] sm:$0xf0] }
  0x1b   :  { %v1994_v6 = vld [vmem:[#allocation8 + $0x1a4] sm:$0xf0]  ;;  %v1621_v9 = vld [vmem:[#allocation8 + $0x1a8] sm:$0xf0]  ;;  %v1648_v14 = vor.u32 %v1997_v10, %v1645_v12  ;;  %v1989_v17 = vld [vmem:[#allocation8 + $0x184] sm:$0xf] }
  0x1c   :  { %547 = vmatpush.bf16.msra.mxu2 %v1652_v3  ;;  %v1620_v11 = vor.u32 %v1994_v6, %v1619_v5  ;;  %561 = vmatpush.bf16.msra.mxu3 %v1656_v7  ;;  %v1624_v13 = vor.u32 %v1990_v8, %v1621_v9  ;;  %v1587_v15 = vld [vmem:[#allocation8 + $0x148] sm:$0xf]  ;;  %v1982_v18 = vld [vmem:[#allocation8 + $0x14c] sm:$0xf]  ;;  %v1613_v20 = vld [vmem:[#allocation8 + $0x1a0] sm:$0xf0] }
  0x1d   :  { %v1986_v16 = vld [vmem:[#allocation8 + $0x164] sm:$0xf0]  ;;  %v1589_v19 = vld [vmem:[#allocation8 + $0x168] sm:$0xf0]  ;;  %533 = vmatpush.bf16.msra.mxu1 %v1648_v14  ;;  %v1616_v21 = vor.u32 %v1989_v17, %v1613_v20  ;;  %v1643_v22 = vld [vmem:[#allocation8 + $0x1c0] sm:$0xf] }
  0x1e   :  { %v1588_v23 = vor.u32 %v1986_v16, %v1587_v15  ;;  %v2001_v24 = vld [vmem:[#allocation8 + $0x1dc] sm:$0xf0]  ;;  %v1981_v25 = vld [vmem:[#allocation8 + $0x144] sm:$0xf]  ;;  %v1592_v27 = vor.u32 %v1982_v18, %v1589_v19  ;;  %v1555_v28 = vld [vmem:[#allocation8 + $0x108] sm:$0xf] }
  0x1f   :  { %v1581_v26 = vld [vmem:[#allocation8 + $0x160] sm:$0xf0]  ;;  %v1978_v29 = vld [vmem:[#allocation8 + $0x124] sm:$0xf0]  ;;  %v1974_v30 = vld [vmem:[#allocation8 + $0x10c] sm:$0xf]  ;;  %v1644_v31 = vor.u32 %v2001_v24, %v1643_v22 }
  0x20   :  { %548 = vmatpush.bf16.msra.mxu2 %v1620_v11  ;;  %562 = vmatpush.bf16.msra.mxu3 %v1624_v13  ;;  %v1557_v32 = vld [vmem:[#allocation8 + $0x128] sm:$0xf0]  ;;  %v1611_v33 = vld [vmem:[#allocation8 + $0x180] sm:$0xf]  ;;  %v1584_v35 = vor.u32 %v1981_v25, %v1581_v26  ;;  %v1556_v37 = vor.u32 %v1978_v29, %v1555_v28  ;;  %v1523_v38 = vld [vmem:[#allocation8 + $0xc8] sm:$0xf] }
  0x21   :  { %v1993_v34 = vld [vmem:[#allocation8 + $0x19c] sm:$0xf0]  ;;  %534 = vmatpush.bf16.msra.mxu1 %v1616_v21  ;;  %519 = vmatpush.bf16.msra.mxu0 %v1644_v31  ;;  %v1973_v39 = vld [vmem:[#allocation8 + $0x104] sm:$0xf]  ;;  %v1560_v41 = vor.u32 %v1974_v30, %v1557_v32  ;;  %v1970_v42 = vld [vmem:[#allocation8 + $0xe4] sm:$0xf0] }
  0x22   :  { %v1612_v36 = vor.u32 %v1993_v34, %v1611_v33  ;;  %v1549_v40 = vld [vmem:[#allocation8 + $0x120] sm:$0xf0]  ;;  %v1579_v43 = vld [vmem:[#allocation8 + $0x140] sm:$0xf]  ;;  %v1966_v45 = vld [vmem:[#allocation8 + $0xcc] sm:$0xf]  ;;  %v1524_v50 = vor.u32 %v1970_v42, %v1523_v38 }
  0x23   :  { %v1985_v44 = vld [vmem:[#allocation8 + $0x15c] sm:$0xf0]  ;;  %v1525_v46 = vld [vmem:[#allocation8 + $0xe8] sm:$0xf0]  ;;  %v1552_v47 = vor.u32 %v1973_v39, %v1549_v40  ;;  %v1965_v49 = vld [vmem:[#allocation8 + $0xc4] sm:$0xf] }
  0x24   :  { %549 = vmatpush.bf16.msra.mxu2 %v1588_v23  ;;  %563 = vmatpush.bf16.msra.mxu3 %v1592_v27  ;;  %v1580_v48 = vor.u32 %v1985_v44, %v1579_v43  ;;  %v1517_v51 = vld [vmem:[#allocation8 + $0xe0] sm:$0xf0]  ;;  %v1547_v52 = vld [vmem:[#allocation8 + $0x100] sm:$0xf]  ;;  %v1528_v54 = vor.u32 %v1966_v45, %v1525_v46  ;;  %v1491_v55 = vld [vmem:[#allocation8 + $0x88] sm:$0xf] }
  0x25   :  { %535 = vmatpush.bf16.msra.mxu1 %v1584_v35  ;;  %520 = vmatpush.bf16.msra.mxu0 %v1612_v36  ;;  %v1977_v53 = vld [vmem:[#allocation8 + $0x11c] sm:$0xf0]  ;;  %v1962_v56 = vld [vmem:[#allocation8 + $0xa4] sm:$0xf0]  ;;  %v1958_v57 = vld [vmem:[#allocation8 + $0x8c] sm:$0xf]  ;;  %v1520_v59 = vor.u32 %v1965_v49, %v1517_v51 }
  0x26   :  { %v1493_v58 = vld [vmem:[#allocation8 + $0xa8] sm:$0xf0]  ;;  %v1548_v60 = vor.u32 %v1977_v53, %v1547_v52  ;;  %v1957_v61 = vld [vmem:[#allocation8 + $0x84] sm:$0xf]  ;;  %v1492_v62 = vor.u32 %v1962_v56, %v1491_v55  ;;  %v1515_v0 = vld [vmem:[#allocation8 + $0xc0] sm:$0xf] }
  0x27   :  { %v1485_v63 = vld [vmem:[#allocation8 + $0xa0] sm:$0xf0]  ;;  %v1969_v1 = vld [vmem:[#allocation8 + $0xdc] sm:$0xf0]  ;;  %v1496_v2 = vor.u32 %v1958_v57, %v1493_v58  ;;  %v1459_v3 = vld [vmem:[#allocation8 + $0x48] sm:$0xf] }
  0x28   :  { %550 = vmatpush.bf16.msra.mxu2 %v1556_v37  ;;  %564 = vmatpush.bf16.msra.mxu3 %v1560_v41  ;;  %v1954_v4 = vld [vmem:[#allocation8 + $0x64] sm:$0xf0]  ;;  %v1950_v5 = vld [vmem:[#allocation8 + $0x4c] sm:$0xf]  ;;  %v1488_v7 = vor.u32 %v1957_v61, %v1485_v63  ;;  %v1516_v8 = vor.u32 %v1969_v1, %v1515_v0  ;;  %v1949_v9 = vld [vmem:[#allocation8 + $0x44] sm:$0xf] }
  0x29   :  { %536 = vmatpush.bf16.msra.mxu1 %v1552_v47  ;;  %521 = vmatpush.bf16.msra.mxu0 %v1580_v48  ;;  %v1461_v6 = vld [vmem:[#allocation8 + $0x68] sm:$0xf0]  ;;  %v1460_v10 = vor.u32 %v1954_v4, %v1459_v3  ;;  %v1453_v11 = vld [vmem:[#allocation8 + $0x60] sm:$0xf0]  ;;  %v1483_v12 = vld [vmem:[#allocation8 + $0x80] sm:$0xf] }
  0x2a   :  { %v1961_v13 = vld [vmem:[#allocation8 + $0x9c] sm:$0xf0]  ;;  %v1464_v14 = vor.u32 %v1950_v5, %v1461_v6  ;;  %v1427_v15 = vld [vmem:[#allocation8 + $0x8] sm:$0xf]  ;;  %v1942_v17 = vld [vmem:[#allocation8 + $0xc] sm:$0xf]  ;;  %v1456_v21 = vor.u32 %v1949_v9, %v1453_v11 }
  0x2b   :  { %v1946_v16 = vld [vmem:[#allocation8 + $0x24] sm:$0xf0]  ;;  %v1429_v18 = vld [vmem:[#allocation8 + $0x28] sm:$0xf0]  ;;  %v1667_v19 = vld [vmem:[#allocation8 + $0x1d8] sm:$0xf]  ;;  %v1484_v22 = vor.u32 %v1961_v13, %v1483_v12 }
  0x2c   :  { %551 = vmatpush.bf16.msra.mxu2 %v1524_v50  ;;  %565 = vmatpush.bf16.msra.mxu3 %v1528_v54  ;;  %v2004_v20 = vld [vmem:[#allocation8 + $0x1f4] sm:$0xf0]  ;;  %v1428_v23 = vor.u32 %v1946_v16, %v1427_v15  ;;  %v1941_v24 = vld [vmem:[#allocation8 + $0x4] sm:$0xf]  ;;  %v1432_v26 = vor.u32 %v1942_v17, %v1429_v18  ;;  %v1451_v27 = vld [vmem:[#allocation8 + $0x40] sm:$0xf] }
  0x2d   :  { %537 = vmatpush.bf16.msra.mxu1 %v1520_v59  ;;  %522 = vmatpush.bf16.msra.mxu0 %v1548_v60  ;;  %v1421_v25 = vld [vmem:[#allocation8 + $0x20] sm:$0xf0]  ;;  %v1953_v28 = vld [vmem:[#allocation8 + $0x5c] sm:$0xf0]  ;;  %v1668_v29 = vor.u32 %v2004_v20, %v1667_v19  ;;  %v1635_v30 = vld [vmem:[#allocation8 + $0x198] sm:$0xf] }
  0x2e   :  { %v1996_v31 = vld [vmem:[#allocation8 + $0x1b4] sm:$0xf0]  ;;  %v1424_v33 = vor.u32 %v1941_v24, %v1421_v25  ;;  %v1452_v34 = vor.u32 %v1953_v28, %v1451_v27  ;;  %v1419_v35 = vld [vmem:[#allocation8] sm:$0xf]  ;;  %v1659_v38 = vld [vmem:[#allocation8 + $0x1d0] sm:$0xf] }
  0x2f   :  { %v2339_v32 = vld [vmem:[#allocation3] sm:$0xff]  ;;  %v1945_v36 = vld [vmem:[#allocation8 + $0x1c] sm:$0xf0]  ;;  %v1636_v37 = vor.u32 %v1996_v31, %v1635_v30  ;;  %v2003_v39 = vld [vmem:[#allocation8 + $0x1ec] sm:$0xf0]  ;;  %vm652_vm1 = vcmask 130048  }
  0x30   :  { %552 = vmatpush.bf16.msra.mxu2 %v1492_v62  ;;  %566 = vmatpush.bf16.msra.mxu3 %v1496_v2  ;;  %v1603_v40 = vld [vmem:[#allocation8 + $0x158] sm:$0xf]  ;;  %v1420_v42 = vor.u32 %v1945_v36, %v1419_v35  ;;  %v1660_v43 = vor.u32 %v2003_v39, %v1659_v38  ;;  %v1627_v45 = vld [vmem:[#allocation8 + $0x190] sm:$0xf]  ;;  %v1999_v17 = vld [vmem:[#allocation8 + $0x1d4] sm:$0xf] }
  0x31   :  { %538 = vmatpush.bf16.msra.mxu1 %v1488_v7  ;;  %523 = vmatpush.bf16.msra.mxu0 %v1516_v8  ;;  %v1988_v41 = vld [vmem:[#allocation8 + $0x174] sm:$0xf0]  ;;  %v1995_v46 = vld [vmem:[#allocation8 + $0x1ac] sm:$0xf0]  ;;  %v1661_v18 = vld [vmem:[#allocation8 + $0x1f0] sm:$0xf0] }
  0x32   :  { %v1604_v44 = vor.u32 %v1988_v41, %v1603_v40  ;;  %v1571_v47 = vld [vmem:[#allocation8 + $0x118] sm:$0xf]  ;;  %v1628_v49 = vor.u32 %v1995_v46, %v1627_v45  ;;  %v1595_v51 = vld [vmem:[#allocation8 + $0x150] sm:$0xf]  ;;  %v1991_v19 = vld [vmem:[#allocation8 + $0x194] sm:$0xf]  ;;  %v1664_v20 = vor.u32 %v1999_v17, %v1661_v18 }
  0x33   :  { %v1980_v48 = vld [vmem:[#allocation8 + $0x134] sm:$0xf0]  ;;  %v1987_v52 = vld [vmem:[#allocation8 + $0x16c] sm:$0xf0]  ;;  %v1597_v24 = vld [vmem:[#allocation8 + $0x170] sm:$0xf0] }
  0x34   :  { %553 = vmatpush.bf16.msra.mxu2 %v1460_v10  ;;  %567 = vmatpush.bf16.msra.mxu3 %v1464_v14  ;;  %v1572_v50 = vor.u32 %v1980_v48, %v1571_v47  ;;  %v1539_v53 = vld [vmem:[#allocation8 + $0xd8] sm:$0xf]  ;;  %v1596_v55 = vor.u32 %v1987_v52, %v1595_v51  ;;  %v1563_v57 = vld [vmem:[#allocation8 + $0x110] sm:$0xf]  ;;  %v1565_v27 = vld [vmem:[#allocation8 + $0x130] sm:$0xf0] }
  0x35   :  { %539 = vmatpush.bf16.msra.mxu1 %v1456_v21  ;;  %524 = vmatpush.bf16.msra.mxu0 %v1484_v22  ;;  %v1972_v54 = vld [vmem:[#allocation8 + $0xf4] sm:$0xf0]  ;;  %v1979_v58 = vld [vmem:[#allocation8 + $0x12c] sm:$0xf0]  ;;  %v1629_v21 = vld [vmem:[#allocation8 + $0x1b0] sm:$0xf0] }
  0x36   :  { %v1540_v56 = vor.u32 %v1972_v54, %v1539_v53  ;;  %v1507_v59 = vld [vmem:[#allocation8 + $0x98] sm:$0xf]  ;;  %v1564_v61 = vor.u32 %v1979_v58, %v1563_v57  ;;  %v1531_v63 = vld [vmem:[#allocation8 + $0xd0] sm:$0xf]  ;;  %v1632_v22 = vor.u32 %v1991_v19, %v1629_v21  ;;  %v1967_v31 = vld [vmem:[#allocation8 + $0xd4] sm:$0xf] }
  0x37   :  { %v1964_v60 = vld [vmem:[#allocation8 + $0xb4] sm:$0xf0]  ;;  %v1971_v0 = vld [vmem:[#allocation8 + $0xec] sm:$0xf0]  ;;  %v1959_v58 = vld [vmem:[#allocation8 + $0x94] sm:$0xf] }
  0x38   :  { %554 = vmatpush.bf16.msra.mxu2 %v1428_v23  ;;  %568 = vmatpush.bf16.msra.mxu3 %v1432_v26  ;;  %v1508_v62 = vor.u32 %v1964_v60, %v1507_v59  ;;  %v1475_v1 = vld [vmem:[#allocation8 + $0x58] sm:$0xf]  ;;  %v1532_v3 = vor.u32 %v1971_v0, %v1531_v63  ;;  %v1499_v5 = vld [vmem:[#allocation8 + $0x90] sm:$0xf]  ;;  %v1983_v23 = vld [vmem:[#allocation8 + $0x154] sm:$0xf] }
  0x39   :  { %540 = vmatpush.bf16.msra.mxu1 %v1424_v33  ;;  %525 = vmatpush.bf16.msra.mxu0 %v1452_v34  ;;  %v1956_v2 = vld [vmem:[#allocation8 + $0x74] sm:$0xf0]  ;;  %v1963_v6 = vld [vmem:[#allocation8 + $0xac] sm:$0xf0]  ;;  %v1600_v25 = vor.u32 %v1983_v23, %v1597_v24  ;;  %v1975_v26 = vld [vmem:[#allocation8 + $0x114] sm:$0xf] }
  0x3a   :  { %v1476_v4 = vor.u32 %v1956_v2, %v1475_v1  ;;  %v1443_v7 = vld [vmem:[#allocation8 + $0x18] sm:$0xf]  ;;  %v1500_v9 = vor.u32 %v1963_v6, %v1499_v5  ;;  %v1467_v11 = vld [vmem:[#allocation8 + $0x50] sm:$0xf]  ;;  %v1533_v33 = vld [vmem:[#allocation8 + $0xf0] sm:$0xf0] }
  0x3b   :  { %555 = vmatmul.bf16.vlgmr.msra.gmra.mxu2 %v2339_v32  ;;  %569 = vmatmul.bf16.vlgmr.msra.gmra.mxu3 %v2339_v32  ;;  %v1948_v8 = vld [vmem:[#allocation8 + $0x34] sm:$0xf0]  ;;  %v1955_v12 = vld [vmem:[#allocation8 + $0x6c] sm:$0xf0]  ;;  %v2347_v34 = vld [vmem:[#allocation9] sm:$0xff]  ;;  %v1536_v38 = vor.u32 %v1967_v31, %v1533_v33  ;;  %s1398_s29 = sshll.u32 %s2432_s6, 4  ;;  %s1399_s29 = int_to_ptr.hbm [resolvable:$true] %s1398_s29 }
  0x3c   :  { %603 = vmatpush.bf16.msrb.mxu2 %v1668_v29  ;;  %541 = vmatmul.bf16.vlgmr.msra.gmra.mxu1 %v2339_v32  ;;  %v1444_v10 = vor.u32 %v1948_v8, %v1443_v7  ;;  %v1468_v13 = vor.u32 %v1955_v12, %v1467_v11  ;;  %v1435_v14 = vld [vmem:[#allocation8 + $0x10] sm:$0xf]  ;;  %v1568_v29 = vor.u32 %v1975_v26, %v1565_v27  ;;  %v180_v39 = vperm.slane %v2347_v34, 3  ;;  %v1501_v59 = vld [vmem:[#allocation8 + $0xb0] sm:$0xf0]  ;;  %s2287_s30 = smov 128  }
  0x3d   :  { %526 = vmatpush.bf16.msra.mxu0 %v1420_v42  ;;  %v1947_v15 = vld [vmem:[#allocation8 + $0x2c] sm:$0xf0]  ;;  %589 = vmatpush.bf16.msrb.mxu1 %v1664_v20  ;;  %v177_v41 = vperm.slane %v2347_v34, 0  ;;  %v178_v48 = vperm.slane %v2347_v34, 1  ;;  %v1951_v60 = vld [vmem:[#allocation8 + $0x54] sm:$0xf] }
  0x3e   :  { %v1436_v16 = vor.u32 %v1947_v15, %v1435_v14  ;;  %v1943_v0 = vld [vmem:[#allocation8 + $0x14] sm:$0xf]  ;;  %v1992_v11 = vld [vmem:[#allocation8 + $0x19c] sm:$0xf]  ;;  %s2288_s7 = smov 8  }
  0x3f   :  { %v1437_v1 = vld [vmem:[#allocation8 + $0x30] sm:$0xf0]  ;;  %v1637_v15 = vld [vmem:[#allocation8 + $0x1b8] sm:$0xf0] }
  0x40   :  { %604 = vmatpush.bf16.msrb.mxu2 %v1636_v37  ;;  %527 = vmatmul.bf16.vlgmr.msra.gmra.mxu0 %v2339_v32  ;;  %v179_v37 = vperm.slane %v2347_v34, 2  ;;  %v1440_v2 = vor.u32 %v1943_v0, %v1437_v1  ;;  %v1984_v18 = vld [vmem:[#allocation8 + $0x15c] sm:$0xf] }
  0x41   :  { %575 = vmatpush.bf16.msrb.mxu0 %v1660_v43  ;;  %590 = vmatpush.bf16.msrb.mxu1 %v1632_v22  ;;  %v1605_v19 = vld [vmem:[#allocation8 + $0x178] sm:$0xf0] }
  0x42   :  { %v1608_v20 = vor.u32 %v1984_v18, %v1605_v19  ;;  %v1976_v22 = vld [vmem:[#allocation8 + $0x11c] sm:$0xf] }
  0x43   :  { %v1573_v23 = vld [vmem:[#allocation8 + $0x138] sm:$0xf0] }
  0x44   :  { %605 = vmatpush.bf16.msrb.mxu2 %v1604_v44  ;;  %v1576_v26 = vor.u32 %v1976_v22, %v1573_v23 }
  0x45   :  { %576 = vmatpush.bf16.msrb.mxu0 %v1628_v49  ;;  %591 = vmatpush.bf16.msrb.mxu1 %v1600_v25 }
  0x48   :  { %606 = vmatpush.bf16.msrb.mxu2 %v1572_v50 }
  0x49   :  { %577 = vmatpush.bf16.msrb.mxu0 %v1596_v55  ;;  %592 = vmatpush.bf16.msrb.mxu1 %v1568_v29  ;;  %v1541_v29 = vld [vmem:[#allocation8 + $0xf8] sm:$0xf0] }
  0x4c   :  { %607 = vmatpush.bf16.msrb.mxu2 %v1540_v56 }
  0x4d   :  { %578 = vmatpush.bf16.msrb.mxu0 %v1564_v61  ;;  %593 = vmatpush.bf16.msrb.mxu1 %v1536_v38  ;;  %v1504_v61 = vor.u32 %v1959_v58, %v1501_v59  ;;  %v1509_v38 = vld [vmem:[#allocation8 + $0xb8] sm:$0xf0]  ;;  %v182_v59 = vperm.slane %v2347_v34, 5 }
  0x50   :  { %608 = vmatpush.bf16.msrb.mxu2 %v1508_v62  ;;  %v1469_v62 = vld [vmem:[#allocation8 + $0x70] sm:$0xf0] }
  0x51   :  { %579 = vmatpush.bf16.msrb.mxu0 %v1532_v3  ;;  %594 = vmatpush.bf16.msrb.mxu1 %v1504_v61  ;;  %v1472_v63 = vor.u32 %v1951_v60, %v1469_v62 }
  0x54   :  { %609 = vmatpush.bf16.msrb.mxu2 %v1476_v4  ;;  %v181_v4 = vperm.slane %v2347_v34, 4 }
  0x55   :  { %580 = vmatpush.bf16.msrb.mxu0 %v1500_v9  ;;  %595 = vmatpush.bf16.msrb.mxu1 %v1472_v63  ;;  %v2000_v9 = vld [vmem:[#allocation8 + $0x1dc] sm:$0xf] }
  0x58   :  { %610 = vmatpush.bf16.msrb.mxu2 %v1444_v10  ;;  %v1669_v10 = vld [vmem:[#allocation8 + $0x1f8] sm:$0xf0] }
  0x59   :  { %581 = vmatpush.bf16.msrb.mxu0 %v1468_v13  ;;  %596 = vmatpush.bf16.msrb.mxu1 %v1440_v2  ;;  %v2072_v13 = vld [vmem:[#allocation6] sm:$0xf]   ;;  %v1672_v14 = vor.u32 %v2000_v9, %v1669_v10 }
  0x5a   :  { %v2073_v17 = vunpack.c.0.s8 %v2072_v13  ;;  %v2074_v25 = vunpack.c.1.s8 %v2072_v13 }
  0x5b   :  { %611 = vmatmul.bf16.vlgmr.msrb.gmra.mxu2 %v2339_v32  ;;  %617 = vmatpush.bf16.msrb.mxu3 %v1672_v14 }
  0x5c   :  { %597 = vmatmul.bf16.vlgmr.msrb.gmra.mxu1 %v2339_v32  ;;  %v2357_v21 = vcvt.s32.f32 %v2073_v17  ;;  %v2364_v33 = vcvt.s32.f32 %v2074_v25 }
  0x5d   :  { %582 = vmatpush.bf16.msrb.mxu0 %v1436_v16  ;;  %v1640_v16 = vor.u32 %v1992_v11, %v1637_v15 }
  0x5e   :  { %vm107_vm0 = vcmp.gt.f32.partialorder %v2357_v21, 0.0  ;;  %vm108_vm2 = vcmp.gt.f32.partialorder %v2364_v33, 0.0 }
  0x5f   :  { %618 = vmatpush.bf16.msrb.mxu3 %v1640_v16 }
  0x60   :  { %583 = vmatmul.bf16.vlgmr.msrb.gmra.mxu0 %v2339_v32 }
  0x63   :  { %619 = vmatpush.bf16.msrb.mxu3 %v1608_v20 }
  0x67   :  { %620 = vmatpush.bf16.msrb.mxu3 %v1576_v26 }
  0xb9   :  { %v542_v35 = vpop.f32.mrf.mxu1 }
  0xba   :  { %v543_v54 = vadd.f32 %v542_v35, %v178_v48 }
  0xbd   :  { %v528_v36 = vpop.f32.mrf.mxu0 }
  0xbe   :  { %v556_v28 = vpop.f32.mrf.mxu2  ;;  %v570_v30 = vpop.f32.mrf.mxu3  ;;  %v529_v50 = vadd.f32 %v528_v36, %v177_v41 }
  0xbf   :  { %v557_v40 = vadd.f32 %v556_v28, %v179_v37  ;;  %v571_v45 = vadd.f32 %v570_v30, %v180_v39  ;;  %v1968_v28 = vld [vmem:[#allocation8 + $0xdc] sm:$0xf] }
  0xc0   :  { %v1544_v35 = vor.u32 %v1968_v28, %v1541_v29  ;;  %v1797_v28 = vld [vmem:[#allocation11 + $0xe0] sm:$0xf]  ;;  %v2037_v29 = vld [vmem:[#allocation11 + $0xec] sm:$0xf0] }
  0xc1   :  { %v544_v51 = vpop.f32.mrf.mxu1 }
  0xc2   :  { %v545_v55 = vadd.f32 %v544_v51, %v178_v48  ;;  %621 = vmatpush.bf16.msrb.mxu3 %v1544_v35  ;;  %v1799_v35 = vld [vmem:[#allocation11 + $0xf0] sm:$0xf0] }
  0xc4   :  { %v699_v57 = vpack.c.bf16 %v545_v55, %v543_v54  ;;  %v1944_v55 = vld [vmem:[#allocation8 + $0x1c] sm:$0xf] }
  0xc5   :  { %v530_v47 = vpop.f32.mrf.mxu0 }
  0xc6   :  { %v558_v42 = vpop.f32.mrf.mxu2  ;;  %v572_v44 = vpop.f32.mrf.mxu3  ;;  %v531_v53 = vadd.f32 %v530_v47, %v177_v41 }
  0xc7   :  { %v559_v43 = vadd.f32 %v558_v42, %v179_v37  ;;  %v573_v46 = vadd.f32 %v572_v44, %v180_v39  ;;  %v1960_v37 = vld [vmem:[#allocation8 + $0x9c] sm:$0xf] }
  0xc8   :  { %v631_v56 = vpack.c.bf16 %v531_v53, %v529_v50  ;;  %v1477_v44 = vld [vmem:[#allocation8 + $0x78] sm:$0xf0] }
  0xc9   :  { %v632_v49 = vpack.c.bf16 %v559_v43, %v557_v40  ;;  %v700_v52 = vpack.c.bf16 %v573_v46, %v571_v45  ;;  %v1512_v40 = vor.u32 %v1960_v37, %v1509_v38  ;;  %v1952_v43 = vld [vmem:[#allocation8 + $0x5c] sm:$0xf]  ;;  %v1781_v37 = vld [vmem:[#allocation11 + $0xc0] sm:$0xf]  ;;  %v2033_v38 = vld [vmem:[#allocation11 + $0xcc] sm:$0xf0] }
  0xcb   :  { %641 = vmatpush.bf16.xpose.msra.mxu0 %v632_v49  ;;  %709 = vmatpush.bf16.xpose.msra.mxu2 %v700_v52  ;;  %v1480_v49 = vor.u32 %v1952_v43, %v1477_v44  ;;  %v1765_v43 = vld [vmem:[#allocation11 + $0xa0] sm:$0xf]  ;;  %v2029_v44 = vld [vmem:[#allocation11 + $0xac] sm:$0xf0] }
  0xcc   :  { %622 = vmatpush.bf16.msrb.mxu3 %v1512_v40  ;;  %v1782_v40 = vor.u32 %v2033_v38, %v1781_v37  ;;  %v1685_v38 = vld [vmem:[#allocation11] sm:$0xf] }
  0xd0   :  { %623 = vmatpush.bf16.msrb.mxu3 %v1480_v49  ;;  %v1749_v49 = vld [vmem:[#allocation11 + $0x80] sm:$0xf] }
  0xd2   :  { %642 = vmatmul.bf16.vlgmr.msra.gmra.mxu0 %v631_v56  ;;  %710 = vmatmul.bf16.vlgmr.msra.gmra.mxu2 %v699_v57  ;;  %v1445_v56 = vld [vmem:[#allocation8 + $0x38] sm:$0xf0] }
  0xd3   :  { %v1448_v57 = vor.u32 %v1944_v55, %v1445_v56  ;;  %v1751_v55 = vld [vmem:[#allocation11 + $0x90] sm:$0xf0] }
  0xd5   :  { %624 = vmatpush.bf16.msrb.mxu3 %v1448_v57 }
  0xd8   :  { %625 = vmatmul.bf16.vlgmr.msrb.gmra.mxu3 %v2339_v32 }
  0xd9   :  { %v598_v58 = vpop.f32.mrf.mxu1 }
  0xda   :  { %v599_v60 = vadd.f32 %v598_v58, %v182_v59  ;;  %v2067_v58 = vld [vmem:[#allocation11 + $0x1e4] sm:$0xf] }
  0xdd   :  { %v584_v3 = vpop.f32.mrf.mxu0 }
  0xde   :  { %v585_v5 = vadd.f32 %v584_v3, %v181_v4  ;;  %v2355_v12 = vpop.f32.mrf.mxu2 }
  0xe1   :  { %v600_v61 = vpop.f32.mrf.mxu1 }
  0xe2   :  { %v601_v62 = vadd.f32 %v600_v61, %v182_v59  ;;  %v1927_v59 = vld [vmem:[#allocation11 + $0x1f0] sm:$0xf0]  ;;  %v1733_v61 = vld [vmem:[#allocation11 + $0x60] sm:$0xf] }
  0xe4   :  { %v701_v63 = vpack.c.bf16 %v601_v62, %v599_v60  ;;  %v1930_v60 = vor.u32 %v2067_v58, %v1927_v59  ;;  %v2021_v62 = vld [vmem:[#allocation11 + $0x6c] sm:$0xf0]  ;;  %v2047_v58 = vld [vmem:[#allocation11 + $0x144] sm:$0xf] }
  0xe5   :  { %v586_v6 = vpop.f32.mrf.mxu0 }
  0xe6   :  { %v587_v7 = vadd.f32 %v586_v6, %v181_v4  ;;  %v2359_v24 = vpop.f32.mrf.mxu2  ;;  %751 = vmatpush.bf16.msra.mxu3 %v701_v63  ;;  %v1909_v63 = vld [vmem:[#allocation11 + $0x1c0] sm:$0xf] }
  0xe8   :  { %v633_v8 = vpack.c.bf16 %v587_v7, %v585_v5 }
  0xea   :  { %684 = vmatpush.bf16.msra.mxu1 %v633_v8  ;;  %1226 = vmatpush.bf16.msrb.mxu3 %v1930_v60  ;;  %v1847_v60 = vld [vmem:[#allocation11 + $0x150] sm:$0xf0] }
 0x14f   :  { %v643_v27 = vpop.f32.mrf.mxu0 }
 0x150   :  { %v648_v30 = vmul.f32 0.35355338, %v643_v27 }
 0x152   :  { %v650_v31 = vsel %vm107_vm0, %v648_v30, -1e+30  ;;  %v2035_v30 = vld [vmem:[#allocation11 + $0xe4] sm:$0xf] }
 0x153   :  { %v653_v36 = vsel %vm652_vm1, %v650_v31, -inf }
 0x154   :  { %654 = vmax.xlane.f32.xlu1 %v653_v36  ;;  %v1802_v36 = vor.u32 %v2035_v30, %v1799_v35  ;;  %v2055_v35 = vld [vmem:[#allocation11 + $0x184] sm:$0xf] }
 0x155   :  { %v711_v39 = vpop.f32.mrf.mxu2 }
 0x156   :  { %v716_v41 = vmul.f32 0.35355338, %v711_v39  ;;  %v2031_v39 = vld [vmem:[#allocation11 + $0xc4] sm:$0xf]  ;;  %1212 = vmatpush.bf16.msrb.mxu2 %v1802_v36  ;;  %v1879_v36 = vld [vmem:[#allocation11 + $0x190] sm:$0xf0] }
 0x157   :  { %v645_v42 = vpop.f32.mrf.mxu0  ;;  %v1882_v37 = vor.u32 %v2055_v35, %v1879_v36  ;;  %v1759_v35 = vld [vmem:[#allocation11 + $0x98] sm:$0xf0] }
 0x158   :  { %v649_v45 = vmul.f32 0.35355338, %v645_v42  ;;  %v718_v46 = vsel %vm107_vm0, %v716_v41, -1e+30  ;;  %v1783_v41 = vld [vmem:[#allocation11 + $0xd0] sm:$0xf0] }
 0x159   :  { %v720_v47 = vsel %vm652_vm1, %v718_v46, -inf  ;;  %v1786_v42 = vor.u32 %v2031_v39, %v1783_v41  ;;  %v2009_v39 = vld [vmem:[#allocation11 + $0xc] sm:$0xf0] }
 0x15a   :  { %v651_v48 = vsel %vm108_vm2, %v649_v45, -1e+30  ;;  %721 = vmax.xlane.f32.xlu0 %v720_v47  ;;  %v2027_v45 = vld [vmem:[#allocation11 + $0xa4] sm:$0xf]  ;;  %v1767_v47 = vld [vmem:[#allocation11 + $0xb0] sm:$0xf0]  ;;  %v1686_v41 = vor.u32 %v2009_v39, %v1685_v38 }
 0x15b   :  { %v656_v50 = vsel %vm652_vm1, %v651_v48, -inf  ;;  %1213 = vmatpush.bf16.msrb.mxu2 %v1786_v42  ;;  %v2053_v42 = vld [vmem:[#allocation11 + $0x16c] sm:$0xf0]  ;;  %v2068_v38 = vld [vmem:[#allocation11 + $0x1ec] sm:$0xf] }
 0x15c   :  { %657 = vmax.xlane.f32.xlu1 %v656_v50  ;;  %v2025_v50 = vld [vmem:[#allocation11 + $0x8c] sm:$0xf0]  ;;  %v1935_v39 = vld [vmem:[#allocation11 + $0x1f8] sm:$0xf0] }
 0x15d   :  { %v713_v51 = vpop.f32.mrf.mxu2 }
 0x15e   :  { %v717_v52 = vmul.f32 0.35355338, %v713_v51  ;;  %v1925_v51 = vld [vmem:[#allocation11 + $0x1e0] sm:$0xf] }
 0x160   :  { %v719_v53 = vsel %vm108_vm2, %v717_v52, -1e+30  ;;  %v1750_v52 = vor.u32 %v2025_v50, %v1749_v49  ;;  %v1805_v49 = vld [vmem:[#allocation11 + $0xe8] sm:$0xf] }
 0x161   :  { %v723_v54 = vsel %vm652_vm1, %v719_v53, -inf }
 0x162   :  { %724 = vmax.xlane.f32.xlu0 %v723_v54  ;;  %v2023_v54 = vld [vmem:[#allocation11 + $0x84] sm:$0xf] }
 0x163   :  { %v1754_v57 = vor.u32 %v2023_v54, %v1751_v55 }
 0x1c7   :  { %v655_v0 = vpop.xlane.xlu1 %654 }
 0x1c8   :  { %v659_v1 = vsub.f32 %v650_v31, %v655_v0  ;;  %v1798_v31 = vor.u32 %v2037_v29, %v1797_v28  ;;  %v1734_v0 = vor.u32 %v2021_v62, %v1733_v61  ;;  %v2011_v28 = vld [vmem:[#allocation11 + $0x24] sm:$0xf]  ;;  %v1703_v29 = vld [vmem:[#allocation11 + $0x30] sm:$0xf0]  ;;  %v1789_v61 = vld [vmem:[#allocation11 + $0xc8] sm:$0xf]  ;;  %v1850_v62 = vor.u32 %v2047_v58, %v1847_v60 }
 0x1c9   :  { %v2018_v58 = vld [vmem:[#allocation11 + $0x54] sm:$0xf0] }
 0x1ca   :  { %v661_v2 = vmul.f32 1.442695, %v659_v1  ;;  %1184 = vmatpush.bf16.msrb.mxu0 %v1798_v31  ;;  %v2065_v1 = vld [vmem:[#allocation11 + $0x1cc] sm:$0xf0]  ;;  %v1706_v31 = vor.u32 %v2011_v28, %v1703_v29  ;;  %v1933_v28 = vld [vmem:[#allocation11 + $0x1e8] sm:$0xf] }
 0x1cc   :  { %2090 = vpow2.f32 %v661_v2  ;;  %v2019_v2 = vld [vmem:[#allocation11 + $0x64] sm:$0xf] }
 0x1cd   :  { %v722_v3 = vpop.xlane.xlu0 %721 }
 0x1ce   :  { %v726_v4 = vsub.f32 %v718_v46, %v722_v3  ;;  %1185 = vmatpush.bf16.msrb.mxu0 %v1782_v40  ;;  %v1766_v46 = vor.u32 %v2029_v44, %v1765_v43  ;;  %v1735_v3 = vld [vmem:[#allocation11 + $0x70] sm:$0xf0]  ;;  %v1861_v40 = vld [vmem:[#allocation11 + $0x160] sm:$0xf]  ;;  %v2007_v43 = vld [vmem:[#allocation11 + $0x4] sm:$0xf] }
 0x1cf   :  { %v658_v5 = vpop.xlane.xlu1 %657  ;;  %v1687_v44 = vld [vmem:[#allocation11 + $0x10] sm:$0xf0] }
 0x1d0   :  { %v660_v6 = vsub.f32 %v651_v48, %v658_v5  ;;  %v728_v7 = vmul.f32 1.442695, %v726_v4  ;;  %v1770_v48 = vor.u32 %v2027_v45, %v1767_v47  ;;  %v1910_v4 = vor.u32 %v2065_v1, %v1909_v63  ;;  %v2051_v47 = vld [vmem:[#allocation11 + $0x164] sm:$0xf]  ;;  %v2034_v63 = vld [vmem:[#allocation11 + $0xd4] sm:$0xf0] }
 0x1d1   :  { %v1738_v5 = vor.u32 %v2019_v2, %v1735_v3  ;;  %v1862_v45 = vor.u32 %v2053_v42, %v1861_v40  ;;  %v1791_v1 = vld [vmem:[#allocation11 + $0xd8] sm:$0xf0]  ;;  %v1790_v3 = vor.u32 %v2034_v63, %v1789_v61  ;;  %v1741_v42 = vld [vmem:[#allocation11 + $0x68] sm:$0xf]  ;;  %v2062_v61 = vld [vmem:[#allocation11 + $0x1b4] sm:$0xf0] }
 0x1d2   :  { %v2091_v8 = vpop.eup %2090  ;;  %v663_v9 = vmul.f32 1.442695, %v660_v6  ;;  %2092 = vpow2.f32 %v728_v7  ;;  %1186 = vmatpush.bf16.msrb.mxu0 %v1766_v46  ;;  %1214 = vmatpush.bf16.msrb.mxu2 %v1770_v48  ;;  %v2063_v6 = vld [vmem:[#allocation11 + $0x1c4] sm:$0xf]  ;;  %v1911_v7 = vld [vmem:[#allocation11 + $0x1d0] sm:$0xf0]  ;;  %v1690_v46 = vor.u32 %v2007_v43, %v1687_v44 }
 0x1d3   :  { %v665_v32 = vmul.f32 %v2091_v8, %v2357_v21  ;;  %v1914_v8 = vor.u32 %v2063_v6, %v1911_v7  ;;  %v1863_v48 = vld [vmem:[#allocation11 + $0x170] sm:$0xf0]  ;;  %v2045_v6 = vld [vmem:[#allocation11 + $0x12c] sm:$0xf0]  ;;  %v2043_v7 = vld [vmem:[#allocation11 + $0x124] sm:$0xf] }
 0x1d4   :  { %2094 = vpow2.f32 %v663_v9  ;;  %v1717_v9 = vld [vmem:[#allocation11 + $0x40] sm:$0xf]  ;;  %v1866_v50 = vor.u32 %v2051_v47, %v1863_v48  ;;  %v2022_v43 = vld [vmem:[#allocation11 + $0x74] sm:$0xf0]  ;;  %v1917_v44 = vld [vmem:[#allocation11 + $0x1c8] sm:$0xf] }
 0x1d5   :  { %v667_v10 = vsel %vm652_vm1, %v665_v32, 0.0  ;;  %v725_v11 = vpop.xlane.xlu0 %724  ;;  %1227 = vmatpush.bf16.msrb.mxu3 %v1914_v8  ;;  %v2066_v47 = vld [vmem:[#allocation11 + $0x1d4] sm:$0xf0]  ;;  %v2020_v48 = vld [vmem:[#allocation11 + $0x6c] sm:$0xf] }
 0x1d6   :  { %668 = vadd.xlane.f32.xlu2 %v667_v10  ;;  %v727_v13 = vsub.f32 %v719_v53, %v725_v11  ;;  %v2069_v53 = vld [vmem:[#allocation11 + $0x1ec] sm:$0xf0]  ;;  %1187 = vmatpush.bf16.msrb.mxu0 %v1750_v52  ;;  %v1893_v10 = vld [vmem:[#allocation11 + $0x1a0] sm:$0xf]  ;;  %v2036_v52 = vld [vmem:[#allocation11 + $0xec] sm:$0xf] }
 0x1d7   :  { %v1926_v56 = vor.u32 %v2069_v53, %v1925_v51  ;;  %1215 = vmatpush.bf16.msrb.mxu2 %v1754_v57  ;;  %v2038_v51 = vld [vmem:[#allocation11 + $0xf4] sm:$0xf0]  ;;  %v1807_v53 = vld [vmem:[#allocation11 + $0xf8] sm:$0xf0]  ;;  %v2049_v57 = vld [vmem:[#allocation11 + $0x14c] sm:$0xf0] }
 0x1d8   :  { %v2093_v14 = vpop.eup %2092  ;;  %v730_v15 = vmul.f32 1.442695, %v727_v13  ;;  %v2061_v13 = vld [vmem:[#allocation11 + $0x1ac] sm:$0xf0]  ;;  %v1806_v54 = vor.u32 %v2038_v51, %v1805_v49  ;;  %v1810_v55 = vor.u32 %v2036_v52, %v1807_v53  ;;  %v1743_v49 = vld [vmem:[#allocation11 + $0x78] sm:$0xf0] }
 0x1d9   :  { %v732_v17 = vmul.f32 %v2093_v14, %v2357_v21  ;;  %1198 = vmatpush.bf16.msrb.mxu1 %v1926_v56  ;;  %v2015_v14 = vld [vmem:[#allocation11 + $0x44] sm:$0xf]  ;;  %v1845_v56 = vld [vmem:[#allocation11 + $0x140] sm:$0xf]  ;;  %v1746_v51 = vor.u32 %v2020_v48, %v1743_v49  ;;  %v2064_v52 = vld [vmem:[#allocation11 + $0x1cc] sm:$0xf] }
 0x1da   :  { %v2095_v16 = vpop.eup %2094  ;;  %2096 = vpow2.f32 %v730_v15  ;;  %1188 = vmatpush.bf16.msrb.mxu0 %v1734_v0  ;;  %v1719_v15 = vld [vmem:[#allocation11 + $0x50] sm:$0xf0]  ;;  %v1846_v59 = vor.u32 %v2049_v57, %v1845_v56  ;;  %v2032_v0 = vld [vmem:[#allocation11 + $0xcc] sm:$0xf]  ;;  %v1919_v53 = vld [vmem:[#allocation11 + $0x1d8] sm:$0xf0] }
 0x1db   :  { %v666_v18 = vmul.f32 %v2095_v16, %v2364_v33  ;;  %v734_v19 = vsel %vm652_vm1, %v732_v17, 0.0  ;;  %1216 = vmatpush.bf16.msrb.mxu2 %v1738_v5  ;;  %v1894_v16 = vor.u32 %v2061_v13, %v1893_v10  ;;  %v1829_v5 = vld [vmem:[#allocation11 + $0x120] sm:$0xf]  ;;  %v2030_v10 = vld [vmem:[#allocation11 + $0xb4] sm:$0xf0]  ;;  %v1922_v56 = vor.u32 %v2064_v52, %v1919_v53 }
 0x1dc   :  { %735 = vadd.xlane.f32.xlu0 %v734_v19  ;;  %v1895_v19 = vld [vmem:[#allocation11 + $0x1b0] sm:$0xf0]  ;;  %v1830_v8 = vor.u32 %v2045_v6, %v1829_v5  ;;  %v1725_v57 = vld [vmem:[#allocation11 + $0x48] sm:$0xf]  ;;  %v1727_v63 = vld [vmem:[#allocation11 + $0x58] sm:$0xf0] }
 0x1dd   :  { %v670_v20 = vsel %vm652_vm1, %v666_v18, 0.0  ;;  %v673_v22 = vpack.c.bf16 %v666_v18, %v665_v32  ;;  %1199 = vmatpush.bf16.msrb.mxu1 %v1910_v4  ;;  %v2017_v32 = vld [vmem:[#allocation11 + $0x4c] sm:$0xf0]  ;;  %v2059_v18 = vld [vmem:[#allocation11 + $0x1a4] sm:$0xf]  ;;  %v1794_v4 = vor.u32 %v2032_v0, %v1791_v1  ;;  %v1726_v60 = vor.u32 %v2018_v58, %v1725_v57 }
 0x1de   :  { %671 = vadd.xlane.f32.xlu2 %v670_v20  ;;  %v1718_v11 = vor.u32 %v2017_v32, %v1717_v9  ;;  %v1898_v20 = vor.u32 %v2059_v18, %v1895_v19  ;;  %v1831_v9 = vld [vmem:[#allocation11 + $0x130] sm:$0xf0]  ;;  %v1773_v32 = vld [vmem:[#allocation11 + $0xa8] sm:$0xf]  ;;  %v2041_v18 = vld [vmem:[#allocation11 + $0x10c] sm:$0xf0] }
 0x1df   :  { %1673 = vmatmul.msk.bf16.vlgmr.msra.gmra.mxu1 %vm652_vm1, %v673_v22  ;;  %v1701_v22 = vld [vmem:[#allocation11 + $0x20] sm:$0xf]  ;;  %v1774_v13 = vor.u32 %v2030_v10, %v1773_v32  ;;  %v2060_v5 = vld [vmem:[#allocation11 + $0x1ac] sm:$0xf]  ;;  %v1903_v6 = vld [vmem:[#allocation11 + $0x1b8] sm:$0xf0] }
 0x1e0   :  { %v2097_v23 = vpop.eup %2096  ;;  %1189 = vmatpush.bf16.msrb.mxu0 %v1718_v11  ;;  %1228 = vmatpush.bf16.msrb.mxu3 %v1898_v20  ;;  %v1834_v11 = vor.u32 %v2043_v7, %v1831_v9  ;;  %v1709_v7 = vld [vmem:[#allocation11 + $0x28] sm:$0xf]  ;;  %v1906_v32 = vor.u32 %v2060_v5, %v1903_v6  ;;  %v2014_v10 = vld [vmem:[#allocation11 + $0x34] sm:$0xf0]  ;;  %v2048_v52 = vld [vmem:[#allocation11 + $0x14c] sm:$0xf] }
 0x1e1   :  { %v733_v25 = vmul.f32 %v2097_v23, %v2364_v33  ;;  %1200 = vmatpush.bf16.msrb.mxu1 %v1894_v16  ;;  %v2013_v23 = vld [vmem:[#allocation11 + $0x2c] sm:$0xf0]  ;;  %v1855_v57 = vld [vmem:[#allocation11 + $0x158] sm:$0xf0]  ;;  %v1821_v5 = vld [vmem:[#allocation11 + $0x108] sm:$0xf] }
 0x1e2   :  { %v1858_v58 = vor.u32 %v2048_v52, %v1855_v57  ;;  %v2042_v6 = vld [vmem:[#allocation11 + $0x114] sm:$0xf0] }
 0x1e3   :  { %v737_v26 = vsel %vm652_vm1, %v733_v25, 0.0  ;;  %v740_v27 = vpack.c.bf16 %v733_v25, %v732_v17  ;;  %v1722_v17 = vor.u32 %v2015_v14, %v1719_v15  ;;  %v1877_v25 = vld [vmem:[#allocation11 + $0x180] sm:$0xf]  ;;  %v2028_v14 = vld [vmem:[#allocation11 + $0xac] sm:$0xf] }
 0x1e4   :  { %738 = vadd.xlane.f32.xlu1 %v737_v26  ;;  %v1702_v26 = vor.u32 %v2013_v23, %v1701_v22  ;;  %1229 = vmatpush.bf16.msrb.mxu3 %v1882_v37  ;;  %v1775_v15 = vld [vmem:[#allocation11 + $0xb8] sm:$0xf0]  ;;  %v2039_v22 = vld [vmem:[#allocation11 + $0x104] sm:$0xf]  ;;  %v1815_v23 = vld [vmem:[#allocation11 + $0x110] sm:$0xf0] }
 0x1e5   :  { %1674 = vmatmul.msk.bf16.vlgmr.msra.gmra.mxu3 %vm652_vm1, %v740_v27  ;;  %1217 = vmatpush.bf16.msrb.mxu2 %v1722_v17  ;;  %v2057_v27 = vld [vmem:[#allocation11 + $0x18c] sm:$0xf0]  ;;  %v1778_v16 = vor.u32 %v2028_v14, %v1775_v15  ;;  %v1813_v17 = vld [vmem:[#allocation11 + $0x100] sm:$0xf]  ;;  %v2012_v14 = vld [vmem:[#allocation11 + $0x2c] sm:$0xf] }
 0x1e6   :  { %v1878_v30 = vor.u32 %v2057_v27, %v1877_v25  ;;  %1190 = vmatpush.bf16.msrb.mxu0 %v1702_v26  ;;  %v1814_v20 = vor.u32 %v2041_v18, %v1813_v17  ;;  %v1818_v25 = vor.u32 %v2039_v22, %v1815_v23  ;;  %v1757_v26 = vld [vmem:[#allocation11 + $0x88] sm:$0xf]  ;;  %v2026_v27 = vld [vmem:[#allocation11 + $0x94] sm:$0xf0]  ;;  %v1711_v15 = vld [vmem:[#allocation11 + $0x38] sm:$0xf0] }
 0x1e7   :  { %v1758_v29 = vor.u32 %v2026_v27, %v1757_v26  ;;  %v1887_v22 = vld [vmem:[#allocation11 + $0x198] sm:$0xf0]  ;;  %v1714_v23 = vor.u32 %v2012_v14, %v1711_v15  ;;  %v1693_v27 = vld [vmem:[#allocation11 + $0x8] sm:$0xf] }
 0x1e8   :  { %1201 = vmatpush.bf16.msrb.mxu1 %v1878_v30  ;;  %1230 = vmatpush.bf16.msrb.mxu3 %v1866_v50  ;;  %v2070_v30 = vld [vmem:[#allocation11 + $0x1f4] sm:$0xf0]  ;;  %v1918_v50 = vor.u32 %v2066_v47, %v1917_v44  ;;  %v1871_v44 = vld [vmem:[#allocation11 + $0x178] sm:$0xf0]  ;;  %v184_v47 = vperm.slane %v2347_v34, 7 }
 0x1e9   :  { %1218 = vmatpush.bf16.msrb.mxu2 %v1706_v31  ;;  %v2024_v31 = vld [vmem:[#allocation11 + $0x8c] sm:$0xf]  ;;  %v1934_v36 = vor.u32 %v2070_v30, %v1933_v28  ;;  %v2010_v28 = vld [vmem:[#allocation11 + $0x14] sm:$0xf0] }
 0x1ea   :  { %1191 = vmatpush.bf16.msrb.mxu0 %v1686_v41  ;;  %v1762_v37 = vor.u32 %v2024_v31, %v1759_v35  ;;  %v1938_v41 = vor.u32 %v2068_v38, %v1935_v39  ;;  %v1694_v31 = vor.u32 %v2010_v28, %v1693_v27  ;;  %v2054_v35 = vld [vmem:[#allocation11 + $0x174] sm:$0xf0] }
 0x1ec   :  { %1202 = vmatpush.bf16.msrb.mxu1 %v1862_v45  ;;  %1231 = vmatpush.bf16.msrb.mxu3 %v1850_v62  ;;  %v2389_v45 = vpop.f32.mrf.mxu3  ;;  %v2016_v62 = vld [vmem:[#allocation11 + $0x4c] sm:$0xf] }
 0x1ed   :  { %1219 = vmatpush.bf16.msrb.mxu2 %v1690_v46  ;;  %v1742_v46 = vor.u32 %v2022_v43, %v1741_v42  ;;  %v2052_v43 = vld [vmem:[#allocation11 + $0x16c] sm:$0xf] }
 0x1ee   :  { %1240 = vmatpush.bf16.msra.mxu0 %v1806_v54  ;;  %v183_v54 = vperm.slane %v2347_v34, 6  ;;  %v1874_v49 = vor.u32 %v2052_v43, %v1871_v44 }
 0x1f0   :  { %1203 = vmatpush.bf16.msrb.mxu1 %v1846_v59  ;;  %1232 = vmatpush.bf16.msrb.mxu3 %v1834_v11  ;;  %v1901_v59 = vld [vmem:[#allocation11 + $0x1a8] sm:$0xf] }
 0x1f1   :  { %1268 = vmatpush.bf16.msra.mxu2 %v1810_v55  ;;  %v1885_v11 = vld [vmem:[#allocation11 + $0x188] sm:$0xf] }
 0x1f2   :  { %1241 = vmatpush.bf16.msra.mxu0 %v1790_v3  ;;  %v1902_v3 = vor.u32 %v2062_v61, %v1901_v59  ;;  %v1837_v59 = vld [vmem:[#allocation11 + $0x128] sm:$0xf]  ;;  %v2044_v61 = vld [vmem:[#allocation11 + $0x12c] sm:$0xf] }
 0x1f4   :  { %1204 = vmatpush.bf16.msrb.mxu1 %v1830_v8  ;;  %1233 = vmatpush.bf16.msrb.mxu3 %v1818_v25  ;;  %v613_v8 = vadd.f32 %v2355_v12, %v183_v54  ;;  %v2395_v25 = vpop.f32.mrf.mxu3 }
 0x1f5   :  { %1269 = vmatpush.bf16.msra.mxu2 %v1794_v4  ;;  %v1730_v4 = vor.u32 %v2016_v62, %v1727_v63  ;;  %v1839_v62 = vld [vmem:[#allocation11 + $0x138] sm:$0xf0]  ;;  %v627_v63 = vadd.f32 %v2389_v45, %v184_v47  ;;  %v629_v14 = vadd.f32 %v2395_v25, %v184_v47 }
 0x1f6   :  { %1242 = vmatpush.bf16.msra.mxu0 %v1774_v13  ;;  %v2058_v13 = vld [vmem:[#allocation11 + $0x194] sm:$0xf0] }
 0x1f8   :  { %1205 = vmatpush.bf16.msrb.mxu1 %v1814_v20  ;;  %1282 = vmatpush.bf16.msra.mxu3 %v1938_v41  ;;  %v1886_v20 = vor.u32 %v2058_v13, %v1885_v11 }
 0x1f9   :  { %1270 = vmatpush.bf16.msra.mxu2 %v1778_v16  ;;  %v2056_v16 = vld [vmem:[#allocation11 + $0x18c] sm:$0xf] }
 0x1fa   :  { %1243 = vmatpush.bf16.msra.mxu0 %v1758_v29  ;;  %v1890_v12 = vor.u32 %v2056_v16, %v1887_v22  ;;  %v1869_v29 = vld [vmem:[#allocation11 + $0x168] sm:$0xf] }
 0x1fb   :  { %v1870_v41 = vor.u32 %v2054_v35, %v1869_v29 }
 0x1fc   :  { %1254 = vmatpush.bf16.msra.mxu1 %v1934_v36  ;;  %1283 = vmatpush.bf16.msra.mxu3 %v1922_v56  ;;  %v2008_v36 = vld [vmem:[#allocation11 + $0xc] sm:$0xf] }
 0x1fd   :  { %1271 = vmatpush.bf16.msra.mxu2 %v1762_v37  ;;  %v1695_v37 = vld [vmem:[#allocation11 + $0x18] sm:$0xf0] }
 0x1fe   :  { %1244 = vmatpush.bf16.msra.mxu0 %v1742_v46  ;;  %v1698_v42 = vor.u32 %v2008_v36, %v1695_v37  ;;  %v615_v46 = vadd.f32 %v2359_v24, %v183_v54 }
 0x200   :  { %1255 = vmatpush.bf16.msra.mxu1 %v1918_v50  ;;  %1284 = vmatpush.bf16.msra.mxu3 %v1906_v32  ;;  %v1853_v50 = vld [vmem:[#allocation11 + $0x148] sm:$0xf]  ;;  %v1822_v32 = vor.u32 %v2042_v6, %v1821_v5 }
 0x201   :  { %1272 = vmatpush.bf16.msra.mxu2 %v1746_v51  ;;  %v2050_v51 = vld [vmem:[#allocation11 + $0x154] sm:$0xf0] }
 0x202   :  { %1245 = vmatpush.bf16.msra.mxu0 %v1726_v60  ;;  %v1854_v56 = vor.u32 %v2050_v51, %v1853_v50  ;;  %v2046_v60 = vld [vmem:[#allocation11 + $0x134] sm:$0xf0] }
 0x204   :  { %1256 = vmatpush.bf16.msra.mxu1 %v1902_v3  ;;  %1285 = vmatpush.bf16.msra.mxu3 %v1890_v12 }
 0x205   :  { %1273 = vmatpush.bf16.msra.mxu2 %v1730_v4  ;;  %v1842_v4 = vor.u32 %v2044_v61, %v1839_v62 }
 0x208   :  { %1257 = vmatpush.bf16.msra.mxu1 %v1886_v20  ;;  %1286 = vmatpush.bf16.msra.mxu3 %v1874_v49 }
 0x209   :  { %1274 = vmatpush.bf16.msra.mxu2 %v1714_v23 }
 0x20c   :  { %1258 = vmatpush.bf16.msra.mxu1 %v1870_v41  ;;  %1287 = vmatpush.bf16.msra.mxu3 %v1858_v58 }
 0x20d   :  { %1275 = vmatpush.bf16.msra.mxu2 %v1698_v42 }
 0x210   :  { %1259 = vmatpush.bf16.msra.mxu1 %v1854_v56  ;;  %1288 = vmatpush.bf16.msra.mxu3 %v1842_v4 }
 0x249   :  { %v669_v2 = vpop.xlane.xlu2 %668 }
 0x24a   :  { %v691_v19 = vmax.f32 %v669_v2, 1e-30 }
 0x24c   :  { %2098 = vrcp.f32 %v691_v19  ;;  %v1710_v19 = vor.u32 %v2014_v10, %v1709_v7  ;;  %v2040_v7 = vld [vmem:[#allocation11 + $0x10c] sm:$0xf] }
 0x24e   :  { %1246 = vmatpush.bf16.msra.mxu0 %v1710_v19 }
 0x24f   :  { %v736_v1 = vpop.xlane.xlu0 %735 }
 0x250   :  { %v758_v17 = vmax.f32 %v736_v1, 1e-30 }
 0x251   :  { %v672_v40 = vpop.xlane.xlu2 %671 }
 0x252   :  { %v692_v55 = vmax.f32 %v672_v40, 1e-30  ;;  %v2099_v0 = vpop.eup %2098  ;;  %1247 = vmatpush.bf16.msra.mxu0 %v1694_v31  ;;  %v2406_v31 = vld [vmem:[%s2431_s5] sm:$0xf]  ;;  %s2286_s5 = smov [#allocation12]  }
 0x253   :  { %v847_v36 = vperm.slane %v2406_v31, 1  ;;  %v846_v44 = vperm.slane %v2406_v31, 0  ;;  %v848_v49 = vperm.slane %v2406_v31, 2  ;;  %s1396_s26 = sshll.u32 %s2286_s5, 4  ;;  %s1397_s26 = int_to_ptr.vmem [resolvable:$true] %s1396_s26 }
 0x254   :  { %2100 = vrcp.f32 %v692_v55 }
 0x255   :  { %2102 = vrcp.f32 %v758_v17 }
 0x257   :  { %v739_v39 = vpop.xlane.xlu1 %738 }
 0x258   :  { %v759_v53 = vmax.f32 %v739_v39, 1e-30 }
 0x25a   :  { %v2101_v38 = vpop.eup %2100  ;;  %2104 = vrcp.f32 %v759_v53 }
 0x25b   :  { %v2103_v24 = vpop.eup %2102 }
 0x25c   :  { %v686_v2 = vpop.f32.mrf.mxu1 }
 0x25d   :  { %v695_v9 = vmul.f32 %v2099_v0, %v686_v2  ;;  %v1838_v2 = vor.u32 %v2046_v60, %v1837_v59 }
 0x25f   :  { %v697_v18 = vadd.f32 %v695_v9, %v613_v8  ;;  %v1823_v8 = vld [vmem:[#allocation11 + $0x118] sm:$0xf0]  ;;  %1260 = vmatpush.bf16.msra.mxu1 %v1838_v2 }
 0x260   :  { %v1826_v11 = vor.u32 %v2040_v7, %v1823_v8  ;;  %v2105_v45 = vpop.eup %2104 }
 0x261   :  { %v766_v26 = vmax.f32 %v697_v18, 0.0 }
 0x262   :  { %1289 = vmatpush.bf16.msra.mxu3 %v1826_v11 }
 0x263   :  { %v768_v30 = vpack.c.bf16 %v766_v26, %v766_v26  ;;  %1261 = vmatpush.bf16.msra.mxu1 %v1822_v32 }
 0x264   :  { %v688_v40 = vpop.f32.mrf.mxu1 }
 0x265   :  { %770 = vst [vmem:[#allocation2] sm:$0xf] %v768_v30  ;;  %v696_v48 = vmul.f32 %v2101_v38, %v688_v40 }
 0x267   :  { %v698_v55 = vadd.f32 %v696_v48, %v615_v46 }
 0x268   :  { %v753_v34 = vpop.f32.mrf.mxu3 }
 0x269   :  { %v767_v54 = vmax.f32 %v698_v55, 0.0  ;;  %v762_v0 = vmul.f32 %v2103_v24, %v753_v34 }
 0x26b   :  { %v769_v1 = vpack.c.bf16 %v767_v54, %v767_v54  ;;  %v764_v3 = vadd.f32 %v762_v0, %v627_v63 }
 0x26c   :  { %v1677_v17 = vld [vmem:[#allocation2] sm:$0xf] }
 0x26d   :  { %771 = vst [vmem:[#allocation2 + $0x8] sm:$0xf] %v769_v1  ;;  %v772_v9 = vmax.f32 %v764_v3, 0.0 }
 0x26f   :  { %v774_v10 = vpack.c.bf16 %v772_v9, %v772_v9 }
 0x270   :  { %v755_v13 = vpop.f32.mrf.mxu3 }
 0x271   :  { %776 = vst [vmem:[#allocation2 + $0x4] sm:$0xf] %v774_v10  ;;  %v763_v15 = vmul.f32 %v2105_v45, %v755_v13 }
 0x273   :  { %v765_v16 = vadd.f32 %v763_v15, %v629_v14 }
 0x274   :  { %v2006_v18 = vld [vmem:[#allocation2 + $0x4] sm:$0xf0] }
 0x275   :  { %v1678_v19 = vor.u32 %v2006_v18, %v1677_v17  ;;  %v773_v20 = vmax.f32 %v765_v16, 0.0  ;;  %v1363_v18 = vlaneseq }
 0x277   :  { %1192 = vmatmul.bf16.vlgmr.msrb.gmra.mxu0 %v1678_v19  ;;  %1220 = vmatmul.bf16.vlgmr.msrb.gmra.mxu2 %v1678_v19  ;;  %v775_v22 = vpack.c.bf16 %v773_v20, %v773_v20 }
 0x278   :  { %v2005_v23 = vld [vmem:[#allocation2 + $0x4] sm:$0xf] }
 0x279   :  { %777 = vst [vmem:[#allocation2 + $0xc] sm:$0xf] %v775_v22 }
 0x280   :  { %v1679_v12 = vld [vmem:[#allocation2 + $0x8] sm:$0xf0] }
 0x281   :  { %v1682_v26 = vor.u32 %v2005_v23, %v1679_v12  ;;  %v1364_v23 = vand.u32 127, %v1363_v18 }
 0x283   :  { %1206 = vmatmul.bf16.vlgmr.msrb.gmra.mxu1 %v1682_v26  ;;  %1234 = vmatmul.bf16.vlgmr.msrb.gmra.mxu3 %v1682_v26  ;;  %vm1365_vm3 = vcmp.lt.s32.totalorder %v1364_v23, 8 }
 0x287   :  { %1248 = vmatmul.bf16.vlgmr.msra.gmra.mxu0 %v1678_v19  ;;  %1276 = vmatmul.bf16.vlgmr.msra.gmra.mxu2 %v1678_v19 }
 0x293   :  { %1262 = vmatmul.bf16.vlgmr.msra.gmra.mxu1 %v1682_v26  ;;  %1290 = vmatmul.bf16.vlgmr.msra.gmra.mxu3 %v1682_v26 }
 0x2f4   :  { %v1193_v25 = vpop.f32.mrf.mxu0 }
 0x2f5   :  { %v1194_v50 = vadd.f32 %v1193_v25, %v846_v44 }
 0x2fa   :  { %v1221_v27 = vpop.f32.mrf.mxu2 }
 0x2fb   :  { %v1222_v39 = vadd.f32 %v1221_v27, %v847_v36 }
 0x2fc   :  { %v1195_v28 = vpop.f32.mrf.mxu0 }
 0x2fd   :  { %v1196_v48 = vadd.f32 %v1195_v28, %v846_v44 }
 0x300   :  { %v1207_v29 = vpop.f32.mrf.mxu1 }
 0x301   :  { %v1208_v53 = vadd.f32 %v1207_v29, %v1194_v50 }
 0x302   :  { %v1223_v37 = vpop.f32.mrf.mxu2 }
 0x303   :  { %v1224_v40 = vadd.f32 %v1223_v37, %v847_v36 }
 0x304   :  { %v1249_v38 = vpop.f32.mrf.mxu0 }
 0x305   :  { %v1250_v55 = vadd.f32 %v1249_v38, %v848_v49 }
 0x306   :  { %v1235_v30 = vpop.f32.mrf.mxu3 }
 0x307   :  { %v1236_v42 = vadd.f32 %v1235_v30, %v1222_v39 }
 0x308   :  { %v1209_v35 = vpop.f32.mrf.mxu1 }
 0x309   :  { %v1210_v51 = vadd.f32 %v1209_v35, %v1196_v48 }
 0x30a   :  { %v1277_v17 = vpop.f32.mrf.mxu2 }
 0x30b   :  { %v1296_v57 = vpack.c.bf16 %v1210_v51, %v1208_v53 }
 0x30c   :  { %v1251_v52 = vpop.f32.mrf.mxu0 }
 0x30d   :  { %v1252_v56 = vadd.f32 %v1251_v52, %v848_v49 }
 0x30e   :  { %v1237_v41 = vpop.f32.mrf.mxu3 }
 0x30f   :  { %v1238_v43 = vadd.f32 %v1237_v41, %v1224_v40 }
 0x310   :  { %v1263_v46 = vpop.f32.mrf.mxu1 }
 0x311   :  { %v1297_v47 = vpack.c.bf16 %v1238_v43, %v1236_v42  ;;  %v1264_v59 = vadd.f32 %v1263_v46, %v1250_v55 }
 0x312   :  { %v1279_v29 = vpop.f32.mrf.mxu2 }
 0x313   :  { %1306 = vmatpush.bf16.xpose.msrb.mxu0 %v1297_v47 }
 0x316   :  { %v1291_v20 = vpop.f32.mrf.mxu3 }
 0x318   :  { %v1265_v58 = vpop.f32.mrf.mxu1 }
 0x319   :  { %v1266_v60 = vadd.f32 %v1265_v58, %v1252_v56 }
 0x31a   :  { %1307 = vmatmul.bf16.vlgmr.msrb.gmra.mxu0 %v1296_v57 }
 0x31b   :  { %v1298_v24 = vpack.c.bf16 %v1266_v60, %v1264_v59 }
 0x31d   :  { %1348 = vmatpush.bf16.msrb.mxu1 %v1298_v24 }
 0x31e   :  { %v1293_v35 = vpop.f32.mrf.mxu3 }
 0x397   :  { %v1308_v54 = vpop.f32.mrf.mxu0 }
 0x398   :  { %v1313_v34 = vmul.f32 0.35355338, %v1308_v54 }
 0x39a   :  { %v1315_v61 = vsel %vm107_vm0, %v1313_v34, -1e+30 }
 0x39b   :  { %v1317_v62 = vsel %vm652_vm1, %v1315_v61, -inf }
 0x39c   :  { %1318 = vmax.xlane.f32.xlu2 %v1317_v62 }
 0x39f   :  { %v1310_v63 = vpop.f32.mrf.mxu0 }
 0x3a0   :  { %v1314_v0 = vmul.f32 0.35355338, %v1310_v63 }
 0x3a2   :  { %v1316_v1 = vsel %vm108_vm2, %v1314_v0, -1e+30 }
 0x3a3   :  { %v1320_v2 = vsel %vm652_vm1, %v1316_v1, -inf }
 0x3a4   :  { %1321 = vmax.xlane.f32.xlu0 %v1320_v2 }
 0x40f   :  { %v1319_v3 = vpop.xlane.xlu2 %1318 }
 0x410   :  { %v1323_v4 = vsub.f32 %v1315_v61, %v1319_v3 }
 0x412   :  { %v1325_v5 = vmul.f32 1.442695, %v1323_v4 }
 0x414   :  { %2106 = vpow2.f32 %v1325_v5 }
 0x417   :  { %v1322_v6 = vpop.xlane.xlu0 %1321 }
 0x418   :  { %v1324_v7 = vsub.f32 %v1316_v1, %v1322_v6 }
 0x41a   :  { %v2107_v8 = vpop.eup %2106  ;;  %v1327_v9 = vmul.f32 1.442695, %v1324_v7 }
 0x41b   :  { %v1329_v32 = vmul.f32 %v2107_v8, %v2357_v21  ;;  %v849_v21 = vperm.slane %v2406_v31, 3 }
 0x41c   :  { %2108 = vpow2.f32 %v1327_v9 }
 0x41d   :  { %v1331_v10 = vsel %vm652_vm1, %v1329_v32, 0.0  ;;  %v1278_v12 = vadd.f32 %v1277_v17, %v849_v21  ;;  %v1280_v36 = vadd.f32 %v1279_v29, %v849_v21 }
 0x41e   :  { %1332 = vadd.xlane.f32.xlu1 %v1331_v10 }
 0x41f   :  { %v1292_v25 = vadd.f32 %v1291_v20, %v1278_v12  ;;  %v1294_v31 = vadd.f32 %v1293_v35, %v1280_v36 }
 0x422   :  { %v2109_v11 = vpop.eup %2108 }
 0x423   :  { %v1330_v45 = vmul.f32 %v2109_v11, %v2364_v33 }
 0x425   :  { %v1334_v13 = vsel %vm652_vm1, %v1330_v45, 0.0  ;;  %v1337_v14 = vpack.c.bf16 %v1330_v45, %v1329_v32 }
 0x426   :  { %1335 = vadd.xlane.f32.xlu2 %v1334_v13 }
 0x427   :  { %1939 = vmatmul.msk.bf16.vlgmr.msrb.gmra.mxu1 %vm652_vm1, %v1337_v14 }
 0x491   :  { %v1333_v15 = vpop.xlane.xlu1 %1332 }
 0x492   :  { %v1355_v16 = vmax.f32 %v1333_v15, 1e-30 }
 0x494   :  { %2110 = vrcp.f32 %v1355_v16 }
 0x499   :  { %v1336_v19 = vpop.xlane.xlu2 %1335 }
 0x49a   :  { %v1356_v22 = vmax.f32 %v1336_v19, 1e-30  ;;  %v2111_v26 = vpop.eup %2110 }
 0x49c   :  { %2112 = vrcp.f32 %v1356_v22 }
 0x4a2   :  { %v2113_v37 = vpop.eup %2112 }
 0x4a4   :  { %v1350_v33 = vpop.f32.mrf.mxu1 }
 0x4a5   :  { %v1359_v27 = vmul.f32 %v2111_v26, %v1350_v33 }
 0x4a7   :  { %v1361_v28 = vadd.f32 %v1359_v27, %v1292_v25 }
 0x4a9   :  { %v1366_v30 = vsel %vm1365_vm3, %v1361_v28, -1e+30 }
 0x4aa   :  { %1368 = vmax.xlane.f32.xlu0 %v1366_v30 }
 0x4ac   :  { %v1352_v38 = vpop.f32.mrf.mxu1 }
 0x4ad   :  { %v1360_v39 = vmul.f32 %v2113_v37, %v1352_v38 }
 0x4af   :  { %v1362_v40 = vadd.f32 %v1360_v39, %v1294_v31 }
 0x4b1   :  { %v1367_v41 = vsel %vm1365_vm3, %v1362_v40, -1e+30 }
 0x4b2   :  { %1370 = vmax.xlane.f32.xlu1 %v1367_v41 }
 0x51d   :  { %v1369_v42 = vpop.xlane.xlu0 %1368 }
 0x51e   :  { %v1372_v43 = vsub.f32 %v1366_v30, %v1369_v42 }
 0x520   :  { %v1374_v44 = vmul.f32 1.442695, %v1372_v43 }
 0x522   :  { %2114 = vpow2.f32 %v1374_v44 }
 0x525   :  { %v1371_v46 = vpop.xlane.xlu1 %1370 }
 0x526   :  { %v1373_v47 = vsub.f32 %v1367_v41, %v1371_v46 }
 0x528   :  { %v2115_v48 = vpop.eup %2114  ;;  %v1376_v49 = vmul.f32 1.442695, %v1373_v47 }
 0x529   :  { %1378 = vadd.xlane.f32.xlu2 %v2115_v48 }
 0x52a   :  { %2116 = vpow2.f32 %v1376_v49 }
 0x530   :  { %v2117_v50 = vpop.eup %2116 }
 0x531   :  { %1380 = vadd.xlane.f32.xlu0 %v2117_v50 }
 0x59c   :  { %v1379_v51 = vpop.xlane.xlu2 %1378 }
 0x59d   :  { %2118 = vlog2.f32 %v1379_v51 }
 0x5a3   :  { %v2119_v52 = vpop.eup %2118 }
 0x5a4   :  { %v1383_v53 = vmul.f32 0.6931472, %v2119_v52  ;;  %v1381_v55 = vpop.xlane.xlu0 %1380 }
 0x5a5   :  { %2120 = vlog2.f32 %v1381_v55 }
 0x5a6   :  { %v1386_v56 = vadd.f32 %v1383_v53, %v1369_v42 }
 0x5a8   :  { %v1388_v57 = vsub.f32 %v1361_v28, %v1386_v56 }
 0x5aa   :  { %1390 = vst [vmem:[#allocation12] sm:$0xff] %v1388_v57 }
 0x5ab   :  { %v2121_v58 = vpop.eup %2120 }
 0x5ac   :  { %v1385_v59 = vmul.f32 0.6931472, %v2121_v58 }
 0x5ae   :  { %v1387_v60 = vadd.f32 %v1385_v59, %v1371_v46 }
 0x5b0   :  { %v1389_v24 = vsub.f32 %v1362_v40, %v1387_v60 }
 0x5b2   :  { %1391 = vst [vmem:[#allocation12 + $0x8] sm:$0xff] %v1389_v24 }
 0x5b3   :  { %1404 = dma.vmem_to_hbm [thread:$0]  %s1397_s26, 256, %s1399_s29, [#allocation5], %s2287_s30, %s2287_s30, %s2288_s7  }
 0x5b4   :  { %2272 = dma.done.wait [#allocation5], 256  }
 0x5b5   :  { %2273 = vsyncadd [#allocation5], 4294967040 }
 0x5b6   :  { %1409 = vsyncpa [#allocation4], 1 }
 0x5b7   :  { %1410 = vsyncpa [#allocation7], 1 }
 0x5b8   :  { %1411 = vsyncpa [#allocation10], 1 }
 0x5b9   :  { %1412 = vsyncpa [#allocation5], 1 }

</bundles_post_ra>
